<compile_context>
chip_gen: v7x
topology: tpu7x:2x2x1
jax: 0.10.0
libtpu: 0.0.40
codegen_flags: <defaults>
</compile_context>

<pallas_src>
import jax
import jax.numpy as jnp
from jax import lax
from jax.experimental import pallas as pl
from jax.experimental.pallas import tpu as pltpu


# ----------------------------------------------------------------------------
# The fused kernel: one grid step == one image.
# Activation layouts inside the kernel (rows = height, cols = channel-blocked
# width) keep every contraction a plain 2-D matmul:
#   y1 : (28, 6*28)   conv1 output        p1 : (14, 6*14)   pooled conv1
#   y2 : (10, 16*10)  conv2 output        p2 : (5, 16*5)    pooled conv2
# ----------------------------------------------------------------------------
def _lenet_kernel(x_ref, t1_ref, b1_ref, sw1_ref, sh1_ref,
                  t2_ref, b2_ref, sw2_ref, sh2_ref,
                  w1f_ref, fb1_ref, fw2_ref, fb2_ref, fw3_ref, fb3_ref,
                  o_ref, p1_ref, p2_ref):
    f32 = jnp.float32

    # ---- conv1 (1->6, k=5, pad=2) as 5 banded matmuls + bias + ReLU --------
    y1 = jnp.zeros((28, 168), f32)
    for di in range(5):
        y1 += jnp.dot(x_ref[0, di:di + 28, :], t1_ref[di],
                      preferred_element_type=f32)
    y1 = jnp.maximum(y1 + b1_ref[...], 0.0)

    # ---- maxpool 2x2: subsample via selection matmuls, reduce with max -----
    cm = jnp.maximum(jnp.dot(y1, sw1_ref[0], preferred_element_type=f32),
                     jnp.dot(y1, sw1_ref[1], preferred_element_type=f32))
    p1_ref[...] = jnp.maximum(
        jnp.dot(sh1_ref[0], cm, preferred_element_type=f32),
        jnp.dot(sh1_ref[1], cm, preferred_element_type=f32))      # (14, 84)

    # ---- conv2 (6->16, k=5, no pad) + bias + ReLU --------------------------
    y2 = jnp.zeros((10, 160), f32)
    for di in range(5):
        y2 += jnp.dot(p1_ref[di:di + 10, :], t2_ref[di],
                      preferred_element_type=f32)
    y2 = jnp.maximum(y2 + b2_ref[...], 0.0)

    # ---- maxpool 2x2 -------------------------------------------------------
    cm2 = jnp.maximum(jnp.dot(y2, sw2_ref[0], preferred_element_type=f32),
                      jnp.dot(y2, sw2_ref[1], preferred_element_type=f32))
    p2_ref[...] = jnp.maximum(
        jnp.dot(sh2_ref[0], cm2, preferred_element_type=f32),
        jnp.dot(sh2_ref[1], cm2, preferred_element_type=f32))     # (5, 80)

    # ---- classifier head (no activations, as in the PyTorch Sequential) ----
    # fc1's (C, H, W) flatten is folded into w1f; fc3 is zero-padded to 128
    # output lanes so the final HBM store is unmasked.
    h = fb1_ref[...]                                              # (1, 120)
    for i in range(5):
        h += jnp.dot(p2_ref[i:i + 1, :], w1f_ref[i],
                     preferred_element_type=f32)
    h = jnp.dot(h, fw2_ref[...], preferred_element_type=f32) + fb2_ref[...]
    out = jnp.dot(h, fw3_ref[...], preferred_element_type=f32) + fb3_ref[...]
    o_ref[0] = out                                                # (1, 128)


# ----------------------------------------------------------------------------
# Weight preprocessing (wrapper-side, tiny, parameter-only).
# ----------------------------------------------------------------------------
def _band_matrix(w, win, wout):
    """w: (O, C, KH, KW) conv weight -> (KH, C*win, O*wout) banded matrices.

    T[di, c*win + wo + dj, o*wout + wo] = w[o, c, di, dj], so that
      conv_out[h, o*wout + wo] = sum_di rows[h+di, :] @ T[di]
    computes the full 2-D convolution (width tap + channel sum in the K axis).
    """
    O, C, KH, KW = w.shape
    o = jnp.arange(O).reshape(O, 1, 1, 1)
    c = jnp.arange(C).reshape(1, C, 1, 1)
    dj = jnp.arange(KW).reshape(1, 1, KW, 1)
    wo = jnp.arange(wout).reshape(1, 1, 1, wout)
    rows = jnp.broadcast_to(c * win + wo + dj, (O, C, KW, wout))
    cols = jnp.broadcast_to(o * wout + wo, (O, C, KW, wout))
    mats = []
    for di in range(KH):
        vals = jnp.broadcast_to(w[:, :, di, :, None], (O, C, KW, wout))
        mats.append(jnp.zeros((C * win, O * wout), jnp.float32)
                    .at[rows, cols].set(vals))
    return jnp.stack(mats, axis=0)


def _col_pool_select(C, w_in):
    """(2, C*w_in, C*w_in//2): pick even/odd columns inside each channel block."""
    w_out = w_in // 2
    k = jnp.arange(C * w_out)
    c, w = k // w_out, k % w_out
    return jnp.stack(
        [jax.nn.one_hot(c * w_in + 2 * w + p, C * w_in, dtype=jnp.float32).T
         for p in range(2)], axis=0)


def _row_pool_select(h_in):
    """(2, h_in//2, h_in): pick even/odd rows."""
    idx = 2 * jnp.arange(h_in // 2)
    return jnp.stack([jax.nn.one_hot(idx + p, h_in, dtype=jnp.float32)
                      for p in range(2)], axis=0)


def _prepare_operands(params):
    t1 = _band_matrix(params["conv1_w"], 32, 28)                    # (5, 32, 168)
    b1 = jnp.repeat(params["conv1_b"], 28)[None, :]                 # (1, 168)
    sw1 = _col_pool_select(6, 28)                                   # (2, 168, 84)
    sh1 = _row_pool_select(28)                                      # (2, 14, 28)
    t2 = _band_matrix(params["conv2_w"], 14, 10)                    # (5, 84, 160)
    b2 = jnp.repeat(params["conv2_b"], 10)[None, :]                 # (1, 160)
    sw2 = _col_pool_select(16, 10)                                  # (2, 160, 80)
    sh2 = _row_pool_select(10)                                      # (2, 5, 10)
    # fc1 with the PyTorch (C, H, W) flatten folded in: w1f[i, o*5+j, n]
    w1f = (params["fc1_w"].reshape(120, 16, 5, 5)
           .transpose(2, 1, 3, 0).reshape(5, 80, 120))              # (5, 80, 120)
    fb1 = params["fc1_b"][None, :]                                  # (1, 120)
    fw2 = params["fc2_w"].T                                         # (120, 84)
    fb2 = params["fc2_b"][None, :]                                  # (1, 84)
    fw3 = jnp.zeros((84, 128), jnp.float32).at[:, :10].set(params["fc3_w"].T)
    fb3 = jnp.zeros((1, 128), jnp.float32).at[:, :10].set(params["fc3_b"][None, :])
    return (t1, b1, sw1, sh1, t2, b2, sw2, sh2, w1f, fb1, fw2, fb2, fw3, fb3)


# ----------------------------------------------------------------------------
# Forward pass
# ----------------------------------------------------------------------------
def lenet_forward(x, params):
    """x: (B, 1, 28, 28) float32 NCHW -> logits (B, 10)."""
    B = x.shape[0]
    xpad = jnp.pad(x[:, 0, :, :], ((0, 0), (2, 2), (2, 2)))          # (B, 32, 32)
    operands = _prepare_operands(params)

    def const_spec(a):
        nd = a.ndim
        return pl.BlockSpec(a.shape, lambda b, _nd=nd: (0,) * _nd)

    out = pl.pallas_call(
        _lenet_kernel,
        out_shape=jax.ShapeDtypeStruct((B, 1, 128), jnp.float32),
        grid=(B,),
        in_specs=[pl.BlockSpec((1, 32, 32), lambda b: (b, 0, 0))]
                 + [const_spec(a) for a in operands],
        out_specs=pl.BlockSpec((1, 1, 128), lambda b: (b, 0, 0)),
        scratch_shapes=[pltpu.VMEM((14, 84), jnp.float32),
                        pltpu.VMEM((5, 80), jnp.float32)],
        compiler_params=pltpu.CompilerParams(
            dimension_semantics=("parallel",)),
    )(xpad, *operands)
    return out.reshape(B, 128)[:, :10]


def init_params(key):
    ks = jax.random.split(key, 10)
    s = 0.05
    return {
        "conv1_w": s * jax.random.normal(ks[0], (6, 1, 5, 5), jnp.float32),
        "conv1_b": s * jax.random.normal(ks[1], (6,), jnp.float32),
        "conv2_w": s * jax.random.normal(ks[2], (16, 6, 5, 5), jnp.float32),
        "conv2_b": s * jax.random.normal(ks[3], (16,), jnp.float32),
        "fc1_w": s * jax.random.normal(ks[4], (120, 400), jnp.float32),
        "fc1_b": s * jax.random.normal(ks[5], (120,), jnp.float32),
        "fc2_w": s * jax.random.normal(ks[6], (84, 120), jnp.float32),
        "fc2_b": s * jax.random.normal(ks[7], (84,), jnp.float32),
        "fc3_w": s * jax.random.normal(ks[8], (10, 84), jnp.float32),
        "fc3_b": s * jax.random.normal(ks[9], (10,), jnp.float32),
    }


# Plain-JAX reference (XLA conv / reduce_window) for a correctness check.
def lenet_reference(x, params):
    dn = ("NCHW", "OIHW", "NCHW")
    y = lax.conv_general_dilated(x, params["conv1_w"], (1, 1),
                                 ((2, 2), (2, 2)), dimension_numbers=dn)
    y = jnp.maximum(y + params["conv1_b"][None, :, None, None], 0.0)
    y = lax.reduce_window(y, -jnp.inf, lax.max, (1, 1, 2, 2), (1, 1, 2, 2), "VALID")
    y = lax.conv_general_dilated(y, params["conv2_w"], (1, 1),
                                 ((0, 0), (0, 0)), dimension_numbers=dn)
    y = jnp.maximum(y + params["conv2_b"][None, :, None, None], 0.0)
    y = lax.reduce_window(y, -jnp.inf, lax.max, (1, 1, 2, 2), (1, 1, 2, 2), "VALID")
    flat = y.reshape(x.shape[0], -1)
    h = flat @ params["fc1_w"].T + params["fc1_b"]
    h = h @ params["fc2_w"].T + params["fc2_b"]
    return h @ params["fc3_w"].T + params["fc3_b"]


if __name__ == "__main__":
    key = jax.random.PRNGKey(0)
    kx, kp = jax.random.split(key)
    # LeNet geometry fixes the spatial size: 28x28, 1 input channel.
    x = jax.random.normal(kx, (2, 1, 28, 28), jnp.float32)
    params = init_params(kp)

    logits = jax.jit(lenet_forward)(x, params)
    logits = jax.block_until_ready(logits)
    assert logits.shape == (2, 10) and logits.dtype == jnp.float32

    ref = jax.block_until_ready(jax.jit(lenet_reference)(x, params))
    err = jnp.max(jnp.abs(logits - ref))
    assert jnp.allclose(logits, ref, atol=1e-4, rtol=1e-4), f"max abs err {err}"
    print("KERNEL_OK")
</pallas_src>

<mosaic_0001>
module attributes {stable_mosaic.version = 11 : i64} {
  func.func @_lenet_kernel(%arg0: i32, %arg1: memref<1x32x32xf32, #tpu.memory_space<vmem>>, %arg2: memref<5x32x168xf32, #tpu.memory_space<vmem>>, %arg3: memref<1x168xf32, #tpu.memory_space<vmem>>, %arg4: memref<2x168x84xf32, #tpu.memory_space<vmem>>, %arg5: memref<2x14x28xf32, #tpu.memory_space<vmem>>, %arg6: memref<5x84x160xf32, #tpu.memory_space<vmem>>, %arg7: memref<1x160xf32, #tpu.memory_space<vmem>>, %arg8: memref<2x160x80xf32, #tpu.memory_space<vmem>>, %arg9: memref<2x5x10xf32, #tpu.memory_space<vmem>>, %arg10: memref<5x80x120xf32, #tpu.memory_space<vmem>>, %arg11: memref<1x120xf32, #tpu.memory_space<vmem>>, %arg12: memref<120x84xf32, #tpu.memory_space<vmem>>, %arg13: memref<1x84xf32, #tpu.memory_space<vmem>>, %arg14: memref<84x128xf32, #tpu.memory_space<vmem>>, %arg15: memref<1x128xf32, #tpu.memory_space<vmem>>, %arg16: memref<1x1x128xf32, #tpu.memory_space<vmem>>, %arg17: memref<14x84xf32, #tpu.memory_space<vmem>>, %arg18: memref<5x80xf32, #tpu.memory_space<vmem>>) attributes {dimension_semantics = [#tpu.dimension_semantics<parallel>], iteration_bounds = array<i64: 2>, scalar_prefetch = 0 : i64, scratch_operands = 2 : i64, tpu.core_type = #tpu.core_type<tc>, window_params = [{transform_indices = @transform_0, window_bounds = array<i64: 1, 32, 32>}, {pipeline_mode = #tpu.pipeline_mode<synchronous>, transform_indices = @transform_1, window_bounds = array<i64: 5, 32, 168>}, {pipeline_mode = #tpu.pipeline_mode<synchronous>, transform_indices = @transform_2, window_bounds = array<i64: 1, 168>}, {pipeline_mode = #tpu.pipeline_mode<synchronous>, transform_indices = @transform_3, window_bounds = array<i64: 2, 168, 84>}, {pipeline_mode = #tpu.pipeline_mode<synchronous>, transform_indices = @transform_4, window_bounds = array<i64: 2, 14, 28>}, {pipeline_mode = #tpu.pipeline_mode<synchronous>, transform_indices = @transform_5, window_bounds = array<i64: 5, 84, 160>}, {pipeline_mode = #tpu.pipeline_mode<synchronous>, transform_indices = @transform_6, window_bounds = array<i64: 1, 160>}, {pipeline_mode = #tpu.pipeline_mode<synchronous>, transform_indices = @transform_7, window_bounds = array<i64: 2, 160, 80>}, {pipeline_mode = #tpu.pipeline_mode<synchronous>, transform_indices = @transform_8, window_bounds = array<i64: 2, 5, 10>}, {pipeline_mode = #tpu.pipeline_mode<synchronous>, transform_indices = @transform_9, window_bounds = array<i64: 5, 80, 120>}, {pipeline_mode = #tpu.pipeline_mode<synchronous>, transform_indices = @transform_10, window_bounds = array<i64: 1, 120>}, {pipeline_mode = #tpu.pipeline_mode<synchronous>, transform_indices = @transform_11, window_bounds = array<i64: 120, 84>}, {pipeline_mode = #tpu.pipeline_mode<synchronous>, transform_indices = @transform_12, window_bounds = array<i64: 1, 84>}, {pipeline_mode = #tpu.pipeline_mode<synchronous>, transform_indices = @transform_13, window_bounds = array<i64: 84, 128>}, {pipeline_mode = #tpu.pipeline_mode<synchronous>, transform_indices = @transform_14, window_bounds = array<i64: 1, 128>}, {transform_indices = @transform_15, window_bounds = array<i64: 1, 1, 128>}]} {
    %cst = arith.constant 0.000000e+00 : f32
    %0 = vector.broadcast %cst : f32 to vector<28x168xf32>
    %c0 = arith.constant 0 : index
    %c0_0 = arith.constant 0 : index
    %c0_1 = arith.constant 0 : index
    %1 = vector.load %arg1[%c0, %c0_0, %c0_1] : memref<1x32x32xf32, #tpu.memory_space<vmem>>, vector<1x28x32xf32>
    %2 = vector.shape_cast %1 : vector<1x28x32xf32> to vector<28x32xf32>
    %c0_2 = arith.constant 0 : index
    %c0_3 = arith.constant 0 : index
    %c0_4 = arith.constant 0 : index
    %3 = vector.load %arg2[%c0_2, %c0_3, %c0_4] : memref<5x32x168xf32, #tpu.memory_space<vmem>>, vector<1x32x168xf32>
    %4 = vector.shape_cast %3 : vector<1x32x168xf32> to vector<32x168xf32>
    %cst_5 = arith.constant dense<0.000000e+00> : vector<28x168xf32>
    %5 = tpu.matmul %2, %4, %cst_5 {dimension_numbers = #tpu.dot_dimension_numbers<[1], [0], [0], [1], [0, 0, 1, 1], [], []>} : vector<28x32xf32>, vector<32x168xf32>, vector<28x168xf32> -> vector<28x168xf32>
    %6 = arith.addf %0, %5 : vector<28x168xf32>
    %c0_6 = arith.constant 0 : index
    %c1 = arith.constant 1 : index
    %c0_7 = arith.constant 0 : index
    %7 = vector.load %arg1[%c0_6, %c1, %c0_7] : memref<1x32x32xf32, #tpu.memory_space<vmem>>, vector<1x28x32xf32>
    %8 = vector.shape_cast %7 : vector<1x28x32xf32> to vector<28x32xf32>
    %c1_8 = arith.constant 1 : index
    %c0_9 = arith.constant 0 : index
    %c0_10 = arith.constant 0 : index
    %9 = vector.load %arg2[%c1_8, %c0_9, %c0_10] : memref<5x32x168xf32, #tpu.memory_space<vmem>>, vector<1x32x168xf32>
    %10 = vector.shape_cast %9 : vector<1x32x168xf32> to vector<32x168xf32>
    %cst_11 = arith.constant dense<0.000000e+00> : vector<28x168xf32>
    %11 = tpu.matmul %8, %10, %cst_11 {dimension_numbers = #tpu.dot_dimension_numbers<[1], [0], [0], [1], [0, 0, 1, 1], [], []>} : vector<28x32xf32>, vector<32x168xf32>, vector<28x168xf32> -> vector<28x168xf32>
    %12 = arith.addf %6, %11 : vector<28x168xf32>
    %c0_12 = arith.constant 0 : index
    %c2 = arith.constant 2 : index
    %c0_13 = arith.constant 0 : index
    %13 = vector.load %arg1[%c0_12, %c2, %c0_13] : memref<1x32x32xf32, #tpu.memory_space<vmem>>, vector<1x28x32xf32>
    %14 = vector.shape_cast %13 : vector<1x28x32xf32> to vector<28x32xf32>
    %c2_14 = arith.constant 2 : index
    %c0_15 = arith.constant 0 : index
    %c0_16 = arith.constant 0 : index
    %15 = vector.load %arg2[%c2_14, %c0_15, %c0_16] : memref<5x32x168xf32, #tpu.memory_space<vmem>>, vector<1x32x168xf32>
    %16 = vector.shape_cast %15 : vector<1x32x168xf32> to vector<32x168xf32>
    %cst_17 = arith.constant dense<0.000000e+00> : vector<28x168xf32>
    %17 = tpu.matmul %14, %16, %cst_17 {dimension_numbers = #tpu.dot_dimension_numbers<[1], [0], [0], [1], [0, 0, 1, 1], [], []>} : vector<28x32xf32>, vector<32x168xf32>, vector<28x168xf32> -> vector<28x168xf32>
    %18 = arith.addf %12, %17 : vector<28x168xf32>
    %c0_18 = arith.constant 0 : index
    %c3 = arith.constant 3 : index
    %c0_19 = arith.constant 0 : index
    %19 = vector.load %arg1[%c0_18, %c3, %c0_19] : memref<1x32x32xf32, #tpu.memory_space<vmem>>, vector<1x28x32xf32>
    %20 = vector.shape_cast %19 : vector<1x28x32xf32> to vector<28x32xf32>
    %c3_20 = arith.constant 3 : index
    %c0_21 = arith.constant 0 : index
    %c0_22 = arith.constant 0 : index
    %21 = vector.load %arg2[%c3_20, %c0_21, %c0_22] : memref<5x32x168xf32, #tpu.memory_space<vmem>>, vector<1x32x168xf32>
    %22 = vector.shape_cast %21 : vector<1x32x168xf32> to vector<32x168xf32>
    %cst_23 = arith.constant dense<0.000000e+00> : vector<28x168xf32>
    %23 = tpu.matmul %20, %22, %cst_23 {dimension_numbers = #tpu.dot_dimension_numbers<[1], [0], [0], [1], [0, 0, 1, 1], [], []>} : vector<28x32xf32>, vector<32x168xf32>, vector<28x168xf32> -> vector<28x168xf32>
    %24 = arith.addf %18, %23 : vector<28x168xf32>
    %c0_24 = arith.constant 0 : index
    %c4 = arith.constant 4 : index
    %c0_25 = arith.constant 0 : index
    %25 = vector.load %arg1[%c0_24, %c4, %c0_25] : memref<1x32x32xf32, #tpu.memory_space<vmem>>, vector<1x28x32xf32>
    %26 = vector.shape_cast %25 : vector<1x28x32xf32> to vector<28x32xf32>
    %c4_26 = arith.constant 4 : index
    %c0_27 = arith.constant 0 : index
    %c0_28 = arith.constant 0 : index
    %27 = vector.load %arg2[%c4_26, %c0_27, %c0_28] : memref<5x32x168xf32, #tpu.memory_space<vmem>>, vector<1x32x168xf32>
    %28 = vector.shape_cast %27 : vector<1x32x168xf32> to vector<32x168xf32>
    %cst_29 = arith.constant dense<0.000000e+00> : vector<28x168xf32>
    %29 = tpu.matmul %26, %28, %cst_29 {dimension_numbers = #tpu.dot_dimension_numbers<[1], [0], [0], [1], [0, 0, 1, 1], [], []>} : vector<28x32xf32>, vector<32x168xf32>, vector<28x168xf32> -> vector<28x168xf32>
    %30 = arith.addf %24, %29 : vector<28x168xf32>
    %c0_30 = arith.constant 0 : index
    %c0_31 = arith.constant 0 : index
    %31 = vector.load %arg3[%c0_30, %c0_31] : memref<1x168xf32, #tpu.memory_space<vmem>>, vector<1x168xf32>
    %32 = vector.broadcast %31 : vector<1x168xf32> to vector<28x168xf32>
    %33 = arith.addf %30, %32 : vector<28x168xf32>
    %cst_32 = arith.constant 0.000000e+00 : f32
    %34 = vector.broadcast %cst_32 : f32 to vector<28x168xf32>
    %35 = arith.maximumf %33, %34 : vector<28x168xf32>
    %c0_33 = arith.constant 0 : index
    %c0_34 = arith.constant 0 : index
    %c0_35 = arith.constant 0 : index
    %36 = vector.load %arg4[%c0_33, %c0_34, %c0_35] : memref<2x168x84xf32, #tpu.memory_space<vmem>>, vector<1x168x84xf32>
    %37 = vector.shape_cast %36 : vector<1x168x84xf32> to vector<168x84xf32>
    %cst_36 = arith.constant dense<0.000000e+00> : vector<28x84xf32>
    %38 = tpu.matmul %35, %37, %cst_36 {dimension_numbers = #tpu.dot_dimension_numbers<[1], [0], [0], [1], [0, 0, 1, 1], [], []>} : vector<28x168xf32>, vector<168x84xf32>, vector<28x84xf32> -> vector<28x84xf32>
    %c1_37 = arith.constant 1 : index
    %c0_38 = arith.constant 0 : index
    %c0_39 = arith.constant 0 : index
    %39 = vector.load %arg4[%c1_37, %c0_38, %c0_39] : memref<2x168x84xf32, #tpu.memory_space<vmem>>, vector<1x168x84xf32>
    %40 = vector.shape_cast %39 : vector<1x168x84xf32> to vector<168x84xf32>
    %cst_40 = arith.constant dense<0.000000e+00> : vector<28x84xf32>
    %41 = tpu.matmul %35, %40, %cst_40 {dimension_numbers = #tpu.dot_dimension_numbers<[1], [0], [0], [1], [0, 0, 1, 1], [], []>} : vector<28x168xf32>, vector<168x84xf32>, vector<28x84xf32> -> vector<28x84xf32>
    %42 = arith.maximumf %38, %41 : vector<28x84xf32>
    %c0_41 = arith.constant 0 : index
    %c0_42 = arith.constant 0 : index
    %c0_43 = arith.constant 0 : index
    %43 = vector.load %arg5[%c0_41, %c0_42, %c0_43] : memref<2x14x28xf32, #tpu.memory_space<vmem>>, vector<1x14x28xf32>
    %44 = vector.shape_cast %43 : vector<1x14x28xf32> to vector<14x28xf32>
    %cst_44 = arith.constant dense<0.000000e+00> : vector<14x84xf32>
    %45 = tpu.matmul %44, %42, %cst_44 {dimension_numbers = #tpu.dot_dimension_numbers<[1], [0], [0], [1], [0, 0, 1, 1], [], []>} : vector<14x28xf32>, vector<28x84xf32>, vector<14x84xf32> -> vector<14x84xf32>
    %c1_45 = arith.constant 1 : index
    %c0_46 = arith.constant 0 : index
    %c0_47 = arith.constant 0 : index
    %46 = vector.load %arg5[%c1_45, %c0_46, %c0_47] : memref<2x14x28xf32, #tpu.memory_space<vmem>>, vector<1x14x28xf32>
    %47 = vector.shape_cast %46 : vector<1x14x28xf32> to vector<14x28xf32>
    %cst_48 = arith.constant dense<0.000000e+00> : vector<14x84xf32>
    %48 = tpu.matmul %47, %42, %cst_48 {dimension_numbers = #tpu.dot_dimension_numbers<[1], [0], [0], [1], [0, 0, 1, 1], [], []>} : vector<14x28xf32>, vector<28x84xf32>, vector<14x84xf32> -> vector<14x84xf32>
    %49 = arith.maximumf %45, %48 : vector<14x84xf32>
    %c0_49 = arith.constant 0 : index
    %c0_50 = arith.constant 0 : index
    %50 = vector.load %arg17[%c0_49, %c0_50] : memref<14x84xf32, #tpu.memory_space<vmem>>, vector<14x84xf32>
    tpu.vector_store %arg17[%c0_49, %c0_50], %49 {strides = array<i32>} : memref<14x84xf32, #tpu.memory_space<vmem>>, vector<14x84xf32>,
    %cst_51 = arith.constant 0.000000e+00 : f32
    %51 = vector.broadcast %cst_51 : f32 to vector<10x160xf32>
    %c0_52 = arith.constant 0 : index
    %c0_53 = arith.constant 0 : index
    %52 = vector.load %arg17[%c0_52, %c0_53] : memref<14x84xf32, #tpu.memory_space<vmem>>, vector<10x84xf32>
    %c0_54 = arith.constant 0 : index
    %c0_55 = arith.constant 0 : index
    %c0_56 = arith.constant 0 : index
    %53 = vector.load %arg6[%c0_54, %c0_55, %c0_56] : memref<5x84x160xf32, #tpu.memory_space<vmem>>, vector<1x84x160xf32>
    %54 = vector.shape_cast %53 : vector<1x84x160xf32> to vector<84x160xf32>
    %cst_57 = arith.constant dense<0.000000e+00> : vector<10x160xf32>
    %55 = tpu.matmul %52, %54, %cst_57 {dimension_numbers = #tpu.dot_dimension_numbers<[1], [0], [0], [1], [0, 0, 1, 1], [], []>} : vector<10x84xf32>, vector<84x160xf32>, vector<10x160xf32> -> vector<10x160xf32>
    %56 = arith.addf %51, %55 : vector<10x160xf32>
    %c1_58 = arith.constant 1 : index
    %c0_59 = arith.constant 0 : index
    %57 = vector.load %arg17[%c1_58, %c0_59] : memref<14x84xf32, #tpu.memory_space<vmem>>, vector<10x84xf32>
    %c1_60 = arith.constant 1 : index
    %c0_61 = arith.constant 0 : index
    %c0_62 = arith.constant 0 : index
    %58 = vector.load %arg6[%c1_60, %c0_61, %c0_62] : memref<5x84x160xf32, #tpu.memory_space<vmem>>, vector<1x84x160xf32>
    %59 = vector.shape_cast %58 : vector<1x84x160xf32> to vector<84x160xf32>
    %cst_63 = arith.constant dense<0.000000e+00> : vector<10x160xf32>
    %60 = tpu.matmul %57, %59, %cst_63 {dimension_numbers = #tpu.dot_dimension_numbers<[1], [0], [0], [1], [0, 0, 1, 1], [], []>} : vector<10x84xf32>, vector<84x160xf32>, vector<10x160xf32> -> vector<10x160xf32>
    %61 = arith.addf %56, %60 : vector<10x160xf32>
    %c2_64 = arith.constant 2 : index
    %c0_65 = arith.constant 0 : index
    %62 = vector.load %arg17[%c2_64, %c0_65] : memref<14x84xf32, #tpu.memory_space<vmem>>, vector<10x84xf32>
    %c2_66 = arith.constant 2 : index
    %c0_67 = arith.constant 0 : index
    %c0_68 = arith.constant 0 : index
    %63 = vector.load %arg6[%c2_66, %c0_67, %c0_68] : memref<5x84x160xf32, #tpu.memory_space<vmem>>, vector<1x84x160xf32>
    %64 = vector.shape_cast %63 : vector<1x84x160xf32> to vector<84x160xf32>
    %cst_69 = arith.constant dense<0.000000e+00> : vector<10x160xf32>
    %65 = tpu.matmul %62, %64, %cst_69 {dimension_numbers = #tpu.dot_dimension_numbers<[1], [0], [0], [1], [0, 0, 1, 1], [], []>} : vector<10x84xf32>, vector<84x160xf32>, vector<10x160xf32> -> vector<10x160xf32>
    %66 = arith.addf %61, %65 : vector<10x160xf32>
    %c3_70 = arith.constant 3 : index
    %c0_71 = arith.constant 0 : index
    %67 = vector.load %arg17[%c3_70, %c0_71] : memref<14x84xf32, #tpu.memory_space<vmem>>, vector<10x84xf32>
    %c3_72 = arith.constant 3 : index
    %c0_73 = arith.constant 0 : index
    %c0_74 = arith.constant 0 : index
    %68 = vector.load %arg6[%c3_72, %c0_73, %c0_74] : memref<5x84x160xf32, #tpu.memory_space<vmem>>, vector<1x84x160xf32>
    %69 = vector.shape_cast %68 : vector<1x84x160xf32> to vector<84x160xf32>
    %cst_75 = arith.constant dense<0.000000e+00> : vector<10x160xf32>
    %70 = tpu.matmul %67, %69, %cst_75 {dimension_numbers = #tpu.dot_dimension_numbers<[1], [0], [0], [1], [0, 0, 1, 1], [], []>} : vector<10x84xf32>, vector<84x160xf32>, vector<10x160xf32> -> vector<10x160xf32>
    %71 = arith.addf %66, %70 : vector<10x160xf32>
    %c4_76 = arith.constant 4 : index
    %c0_77 = arith.constant 0 : index
    %72 = vector.load %arg17[%c4_76, %c0_77] : memref<14x84xf32, #tpu.memory_space<vmem>>, vector<10x84xf32>
    %c4_78 = arith.constant 4 : index
    %c0_79 = arith.constant 0 : index
    %c0_80 = arith.constant 0 : index
    %73 = vector.load %arg6[%c4_78, %c0_79, %c0_80] : memref<5x84x160xf32, #tpu.memory_space<vmem>>, vector<1x84x160xf32>
    %74 = vector.shape_cast %73 : vector<1x84x160xf32> to vector<84x160xf32>
    %cst_81 = arith.constant dense<0.000000e+00> : vector<10x160xf32>
    %75 = tpu.matmul %72, %74, %cst_81 {dimension_numbers = #tpu.dot_dimension_numbers<[1], [0], [0], [1], [0, 0, 1, 1], [], []>} : vector<10x84xf32>, vector<84x160xf32>, vector<10x160xf32> -> vector<10x160xf32>
    %76 = arith.addf %71, %75 : vector<10x160xf32>
    %c0_82 = arith.constant 0 : index
    %c0_83 = arith.constant 0 : index
    %77 = vector.load %arg7[%c0_82, %c0_83] : memref<1x160xf32, #tpu.memory_space<vmem>>, vector<1x160xf32>
    %78 = vector.broadcast %77 : vector<1x160xf32> to vector<10x160xf32>
    %79 = arith.addf %76, %78 : vector<10x160xf32>
    %cst_84 = arith.constant 0.000000e+00 : f32
    %80 = vector.broadcast %cst_84 : f32 to vector<10x160xf32>
    %81 = arith.maximumf %79, %80 : vector<10x160xf32>
    %c0_85 = arith.constant 0 : index
    %c0_86 = arith.constant 0 : index
    %c0_87 = arith.constant 0 : index
    %82 = vector.load %arg8[%c0_85, %c0_86, %c0_87] : memref<2x160x80xf32, #tpu.memory_space<vmem>>, vector<1x160x80xf32>
    %83 = vector.shape_cast %82 : vector<1x160x80xf32> to vector<160x80xf32>
    %cst_88 = arith.constant dense<0.000000e+00> : vector<10x80xf32>
    %84 = tpu.matmul %81, %83, %cst_88 {dimension_numbers = #tpu.dot_dimension_numbers<[1], [0], [0], [1], [0, 0, 1, 1], [], []>} : vector<10x160xf32>, vector<160x80xf32>, vector<10x80xf32> -> vector<10x80xf32>
    %c1_89 = arith.constant 1 : index
    %c0_90 = arith.constant 0 : index
    %c0_91 = arith.constant 0 : index
    %85 = vector.load %arg8[%c1_89, %c0_90, %c0_91] : memref<2x160x80xf32, #tpu.memory_space<vmem>>, vector<1x160x80xf32>
    %86 = vector.shape_cast %85 : vector<1x160x80xf32> to vector<160x80xf32>
    %cst_92 = arith.constant dense<0.000000e+00> : vector<10x80xf32>
    %87 = tpu.matmul %81, %86, %cst_92 {dimension_numbers = #tpu.dot_dimension_numbers<[1], [0], [0], [1], [0, 0, 1, 1], [], []>} : vector<10x160xf32>, vector<160x80xf32>, vector<10x80xf32> -> vector<10x80xf32>
    %88 = arith.maximumf %84, %87 : vector<10x80xf32>
    %c0_93 = arith.constant 0 : index
    %c0_94 = arith.constant 0 : index
    %c0_95 = arith.constant 0 : index
    %89 = vector.load %arg9[%c0_93, %c0_94, %c0_95] : memref<2x5x10xf32, #tpu.memory_space<vmem>>, vector<1x5x10xf32>
    %90 = vector.shape_cast %89 : vector<1x5x10xf32> to vector<5x10xf32>
    %cst_96 = arith.constant dense<0.000000e+00> : vector<5x80xf32>
    %91 = tpu.matmul %90, %88, %cst_96 {dimension_numbers = #tpu.dot_dimension_numbers<[1], [0], [0], [1], [0, 0, 1, 1], [], []>} : vector<5x10xf32>, vector<10x80xf32>, vector<5x80xf32> -> vector<5x80xf32>
    %c1_97 = arith.constant 1 : index
    %c0_98 = arith.constant 0 : index
    %c0_99 = arith.constant 0 : index
    %92 = vector.load %arg9[%c1_97, %c0_98, %c0_99] : memref<2x5x10xf32, #tpu.memory_space<vmem>>, vector<1x5x10xf32>
    %93 = vector.shape_cast %92 : vector<1x5x10xf32> to vector<5x10xf32>
    %cst_100 = arith.constant dense<0.000000e+00> : vector<5x80xf32>
    %94 = tpu.matmul %93, %88, %cst_100 {dimension_numbers = #tpu.dot_dimension_numbers<[1], [0], [0], [1], [0, 0, 1, 1], [], []>} : vector<5x10xf32>, vector<10x80xf32>, vector<5x80xf32> -> vector<5x80xf32>
    %95 = arith.maximumf %91, %94 : vector<5x80xf32>
    %c0_101 = arith.constant 0 : index
    %c0_102 = arith.constant 0 : index
    %96 = vector.load %arg18[%c0_101, %c0_102] : memref<5x80xf32, #tpu.memory_space<vmem>>, vector<5x80xf32>
    tpu.vector_store %arg18[%c0_101, %c0_102], %95 {strides = array<i32>} : memref<5x80xf32, #tpu.memory_space<vmem>>, vector<5x80xf32>,
    %c0_103 = arith.constant 0 : index
    %c0_104 = arith.constant 0 : index
    %97 = vector.load %arg11[%c0_103, %c0_104] : memref<1x120xf32, #tpu.memory_space<vmem>>, vector<1x120xf32>
    %c0_105 = arith.constant 0 : index
    %c0_106 = arith.constant 0 : index
    %98 = vector.load %arg18[%c0_105, %c0_106] : memref<5x80xf32, #tpu.memory_space<vmem>>, vector<1x80xf32>
    %c0_107 = arith.constant 0 : index
    %c0_108 = arith.constant 0 : index
    %c0_109 = arith.constant 0 : index
    %99 = vector.load %arg10[%c0_107, %c0_108, %c0_109] : memref<5x80x120xf32, #tpu.memory_space<vmem>>, vector<1x80x120xf32>
    %100 = vector.shape_cast %99 : vector<1x80x120xf32> to vector<80x120xf32>
    %cst_110 = arith.constant dense<0.000000e+00> : vector<1x120xf32>
    %101 = tpu.matmul %98, %100, %cst_110 {dimension_numbers = #tpu.dot_dimension_numbers<[1], [0], [0], [1], [0, 0, 1, 1], [], []>} : vector<1x80xf32>, vector<80x120xf32>, vector<1x120xf32> -> vector<1x120xf32>
    %102 = arith.addf %97, %101 : vector<1x120xf32>
    %c1_111 = arith.constant 1 : index
    %c0_112 = arith.constant 0 : index
    %103 = vector.load %arg18[%c1_111, %c0_112] : memref<5x80xf32, #tpu.memory_space<vmem>>, vector<1x80xf32>
    %c1_113 = arith.constant 1 : index
    %c0_114 = arith.constant 0 : index
    %c0_115 = arith.constant 0 : index
    %104 = vector.load %arg10[%c1_113, %c0_114, %c0_115] : memref<5x80x120xf32, #tpu.memory_space<vmem>>, vector<1x80x120xf32>
    %105 = vector.shape_cast %104 : vector<1x80x120xf32> to vector<80x120xf32>
    %cst_116 = arith.constant dense<0.000000e+00> : vector<1x120xf32>
    %106 = tpu.matmul %103, %105, %cst_116 {dimension_numbers = #tpu.dot_dimension_numbers<[1], [0], [0], [1], [0, 0, 1, 1], [], []>} : vector<1x80xf32>, vector<80x120xf32>, vector<1x120xf32> -> vector<1x120xf32>
    %107 = arith.addf %102, %106 : vector<1x120xf32>
    %c2_117 = arith.constant 2 : index
    %c0_118 = arith.constant 0 : index
    %108 = vector.load %arg18[%c2_117, %c0_118] : memref<5x80xf32, #tpu.memory_space<vmem>>, vector<1x80xf32>
    %c2_119 = arith.constant 2 : index
    %c0_120 = arith.constant 0 : index
    %c0_121 = arith.constant 0 : index
    %109 = vector.load %arg10[%c2_119, %c0_120, %c0_121] : memref<5x80x120xf32, #tpu.memory_space<vmem>>, vector<1x80x120xf32>
    %110 = vector.shape_cast %109 : vector<1x80x120xf32> to vector<80x120xf32>
    %cst_122 = arith.constant dense<0.000000e+00> : vector<1x120xf32>
    %111 = tpu.matmul %108, %110, %cst_122 {dimension_numbers = #tpu.dot_dimension_numbers<[1], [0], [0], [1], [0, 0, 1, 1], [], []>} : vector<1x80xf32>, vector<80x120xf32>, vector<1x120xf32> -> vector<1x120xf32>
    %112 = arith.addf %107, %111 : vector<1x120xf32>
    %c3_123 = arith.constant 3 : index
    %c0_124 = arith.constant 0 : index
    %113 = vector.load %arg18[%c3_123, %c0_124] : memref<5x80xf32, #tpu.memory_space<vmem>>, vector<1x80xf32>
    %c3_125 = arith.constant 3 : index
    %c0_126 = arith.constant 0 : index
    %c0_127 = arith.constant 0 : index
    %114 = vector.load %arg10[%c3_125, %c0_126, %c0_127] : memref<5x80x120xf32, #tpu.memory_space<vmem>>, vector<1x80x120xf32>
    %115 = vector.shape_cast %114 : vector<1x80x120xf32> to vector<80x120xf32>
    %cst_128 = arith.constant dense<0.000000e+00> : vector<1x120xf32>
    %116 = tpu.matmul %113, %115, %cst_128 {dimension_numbers = #tpu.dot_dimension_numbers<[1], [0], [0], [1], [0, 0, 1, 1], [], []>} : vector<1x80xf32>, vector<80x120xf32>, vector<1x120xf32> -> vector<1x120xf32>
    %117 = arith.addf %112, %116 : vector<1x120xf32>
    %c4_129 = arith.constant 4 : index
    %c0_130 = arith.constant 0 : index
    %118 = vector.load %arg18[%c4_129, %c0_130] : memref<5x80xf32, #tpu.memory_space<vmem>>, vector<1x80xf32>
    %c4_131 = arith.constant 4 : index
    %c0_132 = arith.constant 0 : index
    %c0_133 = arith.constant 0 : index
    %119 = vector.load %arg10[%c4_131, %c0_132, %c0_133] : memref<5x80x120xf32, #tpu.memory_space<vmem>>, vector<1x80x120xf32>
    %120 = vector.shape_cast %119 : vector<1x80x120xf32> to vector<80x120xf32>
    %cst_134 = arith.constant dense<0.000000e+00> : vector<1x120xf32>
    %121 = tpu.matmul %118, %120, %cst_134 {dimension_numbers = #tpu.dot_dimension_numbers<[1], [0], [0], [1], [0, 0, 1, 1], [], []>} : vector<1x80xf32>, vector<80x120xf32>, vector<1x120xf32> -> vector<1x120xf32>
    %122 = arith.addf %117, %121 : vector<1x120xf32>
    %c0_135 = arith.constant 0 : index
    %c0_136 = arith.constant 0 : index
    %123 = vector.load %arg12[%c0_135, %c0_136] : memref<120x84xf32, #tpu.memory_space<vmem>>, vector<120x84xf32>
    %cst_137 = arith.constant dense<0.000000e+00> : vector<1x84xf32>
    %124 = tpu.matmul %122, %123, %cst_137 {dimension_numbers = #tpu.dot_dimension_numbers<[1], [0], [0], [1], [0, 0, 1, 1], [], []>} : vector<1x120xf32>, vector<120x84xf32>, vector<1x84xf32> -> vector<1x84xf32>
    %c0_138 = arith.constant 0 : index
    %c0_139 = arith.constant 0 : index
    %125 = vector.load %arg13[%c0_138, %c0_139] : memref<1x84xf32, #tpu.memory_space<vmem>>, vector<1x84xf32>
    %126 = arith.addf %124, %125 : vector<1x84xf32>
    %c0_140 = arith.constant 0 : index
    %c0_141 = arith.constant 0 : index
    %127 = vector.load %arg14[%c0_140, %c0_141] : memref<84x128xf32, #tpu.memory_space<vmem>>, vector<84x128xf32>
    %cst_142 = arith.constant dense<0.000000e+00> : vector<1x128xf32>
    %128 = tpu.matmul %126, %127, %cst_142 {dimension_numbers = #tpu.dot_dimension_numbers<[1], [0], [0], [1], [0, 0, 1, 1], [], []>} : vector<1x84xf32>, vector<84x128xf32>, vector<1x128xf32> -> vector<1x128xf32>
    %c0_143 = arith.constant 0 : index
    %c0_144 = arith.constant 0 : index
    %129 = vector.load %arg15[%c0_143, %c0_144] : memref<1x128xf32, #tpu.memory_space<vmem>>, vector<1x128xf32>
    %130 = arith.addf %128, %129 : vector<1x128xf32>
    %c0_145 = arith.constant 0 : index
    %c0_146 = arith.constant 0 : index
    %c0_147 = arith.constant 0 : index
    %131 = vector.load %arg16[%c0_145, %c0_146, %c0_147] : memref<1x1x128xf32, #tpu.memory_space<vmem>>, vector<1x1x128xf32>
    %132 = vector.shape_cast %131 : vector<1x1x128xf32> to vector<1x128xf32>
    %133 = vector.shape_cast %130 : vector<1x128xf32> to vector<1x1x128xf32>
    tpu.vector_store %arg16[%c0_145, %c0_146, %c0_147], %133 {strides = array<i32>} : memref<1x1x128xf32, #tpu.memory_space<vmem>>, vector<1x1x128xf32>,
    return
  }
  func.func @transform_0(%arg0: i32) -> (i32, i32, i32) {
    %c0_i32 = arith.constant 0 : i32
    %c0_i32_0 = arith.constant 0 : i32
    %c0_i32_1 = arith.constant 0 : i32
    return %arg0, %c0_i32, %c0_i32_0 : i32, i32, i32
  }
  func.func @transform_1(%arg0: i32) -> (i32, i32, i32) {
    %c0_i32 = arith.constant 0 : i32
    %c0_i32_0 = arith.constant 0 : i32
    %c0_i32_1 = arith.constant 0 : i32
    %c0_i32_2 = arith.constant 0 : i32
    return %c0_i32, %c0_i32_0, %c0_i32_1 : i32, i32, i32
  }
  func.func @transform_2(%arg0: i32) -> (i32, i32) {
    %c0_i32 = arith.constant 0 : i32
    %c0_i32_0 = arith.constant 0 : i32
    %c0_i32_1 = arith.constant 0 : i32
    return %c0_i32, %c0_i32_0 : i32, i32
  }
  func.func @transform_3(%arg0: i32) -> (i32, i32, i32) {
    %c0_i32 = arith.constant 0 : i32
    %c0_i32_0 = arith.constant 0 : i32
    %c0_i32_1 = arith.constant 0 : i32
    %c0_i32_2 = arith.constant 0 : i32
    return %c0_i32, %c0_i32_0, %c0_i32_1 : i32, i32, i32
  }
  func.func @transform_4(%arg0: i32) -> (i32, i32, i32) {
    %c0_i32 = arith.constant 0 : i32
    %c0_i32_0 = arith.constant 0 : i32
    %c0_i32_1 = arith.constant 0 : i32
    %c0_i32_2 = arith.constant 0 : i32
    return %c0_i32, %c0_i32_0, %c0_i32_1 : i32, i32, i32
  }
  func.func @transform_5(%arg0: i32) -> (i32, i32, i32) {
    %c0_i32 = arith.constant 0 : i32
    %c0_i32_0 = arith.constant 0 : i32
    %c0_i32_1 = arith.constant 0 : i32
    %c0_i32_2 = arith.constant 0 : i32
    return %c0_i32, %c0_i32_0, %c0_i32_1 : i32, i32, i32
  }
  func.func @transform_6(%arg0: i32) -> (i32, i32) {
    %c0_i32 = arith.constant 0 : i32
    %c0_i32_0 = arith.constant 0 : i32
    %c0_i32_1 = arith.constant 0 : i32
    return %c0_i32, %c0_i32_0 : i32, i32
  }
  func.func @transform_7(%arg0: i32) -> (i32, i32, i32) {
    %c0_i32 = arith.constant 0 : i32
    %c0_i32_0 = arith.constant 0 : i32
    %c0_i32_1 = arith.constant 0 : i32
    %c0_i32_2 = arith.constant 0 : i32
    return %c0_i32, %c0_i32_0, %c0_i32_1 : i32, i32, i32
  }
  func.func @transform_8(%arg0: i32) -> (i32, i32, i32) {
    %c0_i32 = arith.constant 0 : i32
    %c0_i32_0 = arith.constant 0 : i32
    %c0_i32_1 = arith.constant 0 : i32
    %c0_i32_2 = arith.constant 0 : i32
    return %c0_i32, %c0_i32_0, %c0_i32_1 : i32, i32, i32
  }
  func.func @transform_9(%arg0: i32) -> (i32, i32, i32) {
    %c0_i32 = arith.constant 0 : i32
    %c0_i32_0 = arith.constant 0 : i32
    %c0_i32_1 = arith.constant 0 : i32
    %c0_i32_2 = arith.constant 0 : i32
    return %c0_i32, %c0_i32_0, %c0_i32_1 : i32, i32, i32
  }
  func.func @transform_10(%arg0: i32) -> (i32, i32) {
    %c0_i32 = arith.constant 0 : i32
    %c0_i32_0 = arith.constant 0 : i32
    %c0_i32_1 = arith.constant 0 : i32
    return %c0_i32, %c0_i32_0 : i32, i32
  }
  func.func @transform_11(%arg0: i32) -> (i32, i32) {
    %c0_i32 = arith.constant 0 : i32
    %c0_i32_0 = arith.constant 0 : i32
    %c0_i32_1 = arith.constant 0 : i32
    return %c0_i32, %c0_i32_0 : i32, i32
  }
  func.func @transform_12(%arg0: i32) -> (i32, i32) {
    %c0_i32 = arith.constant 0 : i32
    %c0_i32_0 = arith.constant 0 : i32
    %c0_i32_1 = arith.constant 0 : i32
    return %c0_i32, %c0_i32_0 : i32, i32
  }
  func.func @transform_13(%arg0: i32) -> (i32, i32) {
    %c0_i32 = arith.constant 0 : i32
    %c0_i32_0 = arith.constant 0 : i32
    %c0_i32_1 = arith.constant 0 : i32
    return %c0_i32, %c0_i32_0 : i32, i32
  }
  func.func @transform_14(%arg0: i32) -> (i32, i32) {
    %c0_i32 = arith.constant 0 : i32
    %c0_i32_0 = arith.constant 0 : i32
    %c0_i32_1 = arith.constant 0 : i32
    return %c0_i32, %c0_i32_0 : i32, i32
  }
  func.func @transform_15(%arg0: i32) -> (i32, i32, i32) {
    %c0_i32 = arith.constant 0 : i32
    %c0_i32_0 = arith.constant 0 : i32
    %c0_i32_1 = arith.constant 0 : i32
    return %arg0, %c0_i32, %c0_i32_0 : i32, i32, i32
  }
}

</mosaic_0001>

<bundles_post_ra>
// kernel: lenet_forward.1
= control target key start
LH: loop header
LB: loop body
LE: loop exit
PB: predicated region body
PF: predicated region fallthrough
CT: control target
= control target key end

     0   :  { %s5714_s0 = inlined_call_operand.vmem [shape: f32[2,32,32], index: 0, kind: input, shape index: {}]   ;;  %s5715_s1 = inlined_call_operand.vmem [shape: f32[5,32,168], index: 1, kind: input, shape index: {}]   ;;  %s5716_s2 = inlined_call_operand.vmem [shape: f32[1,168], index: 2, kind: input, shape index: {}]   ;;  %s5717_s3 = inlined_call_operand.vmem [shape: f32[2,168,84], index: 3, kind: input, shape index: {}]   ;;  %s5718_s4 = inlined_call_operand.vmem [shape: f32[2,14,28], index: 4, kind: input, shape index: {}]   ;;  %s5719_s5 = inlined_call_operand.vmem [shape: f32[5,84,160], index: 5, kind: input, shape index: {}]   ;;  %s5720_s6 = inlined_call_operand.vmem [shape: f32[1,160], index: 6, kind: input, shape index: {}]   ;;  %s5721_s7 = inlined_call_operand.vmem [shape: f32[2,160,80], index: 7, kind: input, shape index: {}]   ;;  %s5722_s8 = inlined_call_operand.vmem [shape: f32[2,5,10], index: 8, kind: input, shape index: {}]   ;;  %s5723_s9 = inlined_call_operand.vmem [shape: f32[5,80,120], index: 9, kind: input, shape index: {}]   ;;  %s5724_s10 = inlined_call_operand.vmem [shape: f32[1,120], index: 10, kind: input, shape index: {}]   ;;  %s5725_s11 = inlined_call_operand.vmem [shape: f32[120,84], index: 11, kind: input, shape index: {}]   ;;  %s5726_s12 = inlined_call_operand.vmem [shape: f32[1,84], index: 12, kind: input, shape index: {}]   ;;  %s5727_s13 = inlined_call_operand.vmem [shape: f32[84,128], index: 13, kind: input, shape index: {}]   ;;  %s5728_s14 = inlined_call_operand.vmem [shape: f32[1,128], index: 14, kind: input, shape index: {}]   ;;  %s5729_s15 = inlined_call_operand.hbm [shape: f32[2,1,128], index: 15, kind: output, shape index: {}]  }
   0x1   :  { %5736 = sst [smem:[#allocation13_spill]] %s5714_s0 }
   0x2   :  { %20 = vsyncpa [#allocation5], 0 }
   0x3   :  { %22 = vsyncpa [#allocation5 + $0x1], 0  ;;  %s4398_s18 = smov 0   ;;  %s4400_s19 = smov 0  }
   0x4   :  { %s4402_s20 = smov 0   ;;  %s4404_s21 = smov 0  }
   0x5 LB: > { %5737 = sst [smem:[#allocation7_spill]] %s4299_s18  ;;  %s4419_s22 = sadd.s32 4294967295, %s4311_s21   ;;  %s4311_s21 = sphi %s4404_s21, %s5749_s21   ;;  %s4307_s20 = sphi %s4402_s20, %s5751_s20   ;;  %s4303_s19 = sphi %s4400_s19, %s5753_s19   ;;  %s4299_s18 = sphi %s4398_s18, %s5752_s18  }
   0x6   : > { %5738 = sst [smem:[#allocation8_spill]] %s4307_s20  ;;  %s3157_s23 = sadd.s32 4294967294, %s4311_s21  }
   0x7   : > { %5739 = sst [smem:[#allocation9_spill]] %s4311_s21  ;;  %s4423_s24 = sadd.s32 1, %s4311_s21  }
   0x8   : > { %5740 = sst [smem:[#allocation10_spill]] %s4423_s24  ;;  %s355_s25 = sadd.s32 1, %s4307_s20 }
   0x9   : > { %s352_s26 = ssub.s32 %s4311_s21, %s4423_s24  ;;  %p365_p0 = scmp.ne.s32.totalorder %s4307_s20, %s4303_s19 }
   0xa   : > { %p353_p1 = scmp.eq.s32.totalorder %s352_s26, 0  ;;  %p366_p2 = scmp.eq.s32.totalorder %s4419_s22, 1 }
   0xb   : > { %p371_p3 = scmp.ne.s32.totalorder %s4303_s19, %s4299_s18  ;;  %p372_p4 = scmp.eq.s32.totalorder %s3157_s23, 1 }
   0xc   : > { %s4434_s27 = scalar_select %p353_p1, %s4307_s20, %s355_s25  }
   0xd   : > { %p4436_p5 = por %p366_p2, %p365_p0  ;;  %p4440_p6 = por %p372_p4, %p371_p3 }
   0xe   : > { %5741 = sst [smem:[#allocation11_spill]] %s4434_s27  ;;  %p3160_p7 = scmp.ge.s32.totalorder %s4311_s21, 1 }
   0xf   : > { %s5743_s29 = scalar_select %p4440_p6, 1, 0 }
  0x10   : > { %p440_p8 = scmp.lt.s32.totalorder %s4311_s21, 3 }
  0x11   : > { %5744 = sst [smem:[#allocation12_spill]] %s5743_s29 }
  0x12   : > { %p441_p9 = pnand %p3160_p7, %p440_p8 }
  0x13   : > { %v3164_v0 = vld [vmem:[%s5715_s1 + $0x48] sm:$0xff] (!%p441_p9)  ;;  %v3166_v1 = vld [vmem:[%s5715_s1 + $0x58] sm:$0xff] (!%p441_p9)  ;;  %v3163_v2 = vld [vmem:[%s5715_s1 + $0x40] sm:$0xff] (!%p441_p9)  ;;  %p487_p10 = scmp.lt.s32.totalorder (!%p441_p9), %s4419_s22, 1  ;;  %v4313_v7 = vmov (!%p441_p9), 0.0   ;;  %v4314_v13 = vmov (!%p441_p9), 0.0|0.0  }
  0x14   : > { %444 = sbr.rel (%p441_p9) target bundleno = 2330 (0x91a), region = 80  ;;  %v3751_v3 = vpack.c.bf16 (!%p441_p9), %v3166_v1, %v3164_v0  ;;  %v3165_v4 = vld [vmem:[%s5715_s1 + $0x50] sm:$0xff] (!%p441_p9)  ;;  %v3168_v5 = vld [vmem:[%s5715_s1 + $0x68] sm:$0xff] (!%p441_p9)  ;;  %v3170_v6 = vld [vmem:[%s5715_s1 + $0x78] sm:$0xff] (!%p441_p9)  ;;  %594 = vmatprep.mubr.f32.mxu0 (!%p441_p9), %v4313_v7  ;;  %3791 = vmatprep.subr.bf16.mxu1 (!%p441_p9), %v4314_v13  ;;  %s5745_s0 = sld [smem:[#allocation13_spill]] (!%p441_p9)  ;;  %vm517_vm0 = vcmask (!%p441_p9), 261120  }
  0x15   : > { %v3753_v8 = vpack.c.bf16 (!%p441_p9), %v3165_v4, %v3163_v2  ;;  %v3755_v9 = vpack.c.bf16 (!%p441_p9), %v3170_v6, %v3168_v5  ;;  %v3167_v10 = vld [vmem:[%s5715_s1 + $0x60] sm:$0xff] (!%p441_p9)  ;;  %v3169_v11 = vld [vmem:[%s5715_s1 + $0x70] sm:$0xff] (!%p441_p9)  ;;  %v497_v12 = vld [vmem:[%s5715_s1 + $0x8] sm:$0xff] (!%p441_p9)  ;;  %vm1135_vm1 = vcmask (!%p441_p9), 326656   ;;  %vm1346_vm2 = vcmask (!%p441_p9), 228352   ;;  %s485_s29 = sand.u32 (!%p441_p9), 1, %s4303_s19  }
  0x16   : > { %3752 = vmatprep.subr.bf16.mxu0 (!%p441_p9), %v3751_v3  ;;  %v499_v14 = vld [vmem:[%s5715_s1 + $0x18] sm:$0xff] (!%p441_p9)  ;;  %v3757_v15 = vpack.c.bf16 (!%p441_p9), %v3169_v11, %v3167_v10  ;;  %v496_v17 = vld [vmem:[%s5715_s1] sm:$0xff] (!%p441_p9)  ;;  %v498_v18 = vld [vmem:[%s5715_s1 + $0x10] sm:$0xff] (!%p441_p9)  ;;  %vm1353_vm3 = vcmask (!%p441_p9), 1043456   ;;  %vm4315_vm4 = vmmov (!%p441_p9), 1   ;;  %vm1520_vm6 = vcmask (!%p441_p9), 685056  }
  0x17   : > { %3754 = vmatpush1.bf16.msra.mxu0 (!%p441_p9), %v3753_v8  ;;  %v3759_v16 = vpack.c.bf16 (!%p441_p9), %v499_v14, %v497_v12  ;;  %v501_v19 = vld [vmem:[%s5715_s1 + $0x28] sm:$0xff] (!%p441_p9)  ;;  %v503_v20 = vld [vmem:[%s5715_s1 + $0x38] sm:$0xff] (!%p441_p9)  ;;  %v3761_v22 = vpack.c.bf16 (!%p441_p9), %v498_v18, %v496_v17  ;;  %v500_v24 = vld [vmem:[%s5715_s1 + $0x20] sm:$0xff] (!%p441_p9)  ;;  %vm1518_vm7 = vcmask (!%p441_p9), 687104   ;;  %vm4316_vm8 = vmmov (!%p441_p9), 0  }
  0x18   : > { %3756 = vmatprep.subr.bf16.mxu0 (!%p441_p9), %v3755_v9  ;;  %v3763_v23 = vpack.c.bf16 (!%p441_p9), %v503_v20, %v501_v19  ;;  %v502_v25 = vld [vmem:[%s5715_s1 + $0x30] sm:$0xff] (!%p441_p9)  ;;  %v3180_v26 = vld [vmem:[%s5715_s1 + $0x88] sm:$0xff] (!%p441_p9)  ;;  %v3182_v27 = vld [vmem:[%s5715_s1 + $0x98] sm:$0xff] (!%p441_p9)  ;;  %vm2327_vm9 = vcmask (!%p441_p9), 1041408   ;;  %vm2323_vm11 = vcmask (!%p441_p9), 80896   ;;  %vm2477_vm12 = vcmask (!%p441_p9), 651264  }
  0x19   : > { %v3765_v29 = vpack.c.bf16 (!%p441_p9), %v502_v25, %v500_v24  ;;  %v3767_v30 = vpack.c.bf16 (!%p441_p9), %v3182_v27, %v3180_v26  ;;  %v1114_v33 = vld [vmem:[%s5717_s3] sm:$0xff] (!%p441_p9)  ;;  %v1115_v34 = vld [vmem:[%s5717_s3 + $0x8] sm:$0xff] (!%p441_p9)  ;;  %v1116_v35 = vld [vmem:[%s5717_s3 + $0x10] sm:$0xff] (!%p441_p9)  ;;  %vm2491_vm13 = vcmask (!%p441_p9), 654336   ;;  %vm2926_vm14 = vcmask (!%p441_p9), 982016  }
  0x1a   : > { %v3179_v36 = vld [vmem:[%s5715_s1 + $0x80] sm:$0xff] (!%p441_p9)  ;;  %v3181_v37 = vld [vmem:[%s5715_s1 + $0x90] sm:$0xff] (!%p441_p9)  ;;  %v3792_v38 = vpack.c.bf16 (!%p441_p9), %v1115_v34, %v1114_v33  ;;  %v1117_v39 = vld [vmem:[%s5717_s3 + $0x18] sm:$0xff] (!%p441_p9) }
  0x1b   : > { %s488_s27 = scalar_select %p487_p10, %s4419_s22, 1  ;;  %3758 = vmatpush1.bf16.msra.mxu0 %v3757_v15  ;;  %v3184_v40 = vld [vmem:[%s5715_s1 + $0xa8] sm:$0xff]  ;;  %v3186_v41 = vld [vmem:[%s5715_s1 + $0xb8] sm:$0xff]  ;;  %v3795_v42 = vpack.c.bf16 %v1117_v39, %v1116_v35  ;;  %v3769_v44 = vpack.c.bf16 %v3181_v37, %v3179_v36  ;;  %v1118_v45 = vld [vmem:[%s5717_s3 + $0x20] sm:$0xff] }
  0x1c   : > { %3760 = vmatprep.subr.bf16.mxu0 %v3759_v16  ;;  %3793 = vmatpush1.bf16.msra.mxu1 %v3792_v38  ;;  %v1119_v46 = vld [vmem:[%s5717_s3 + $0x28] sm:$0xff]  ;;  %v3771_v47 = vpack.c.bf16 %v3186_v41, %v3184_v40  ;;  %v3183_v48 = vld [vmem:[%s5715_s1 + $0xa0] sm:$0xff]  ;;  %v3185_v49 = vld [vmem:[%s5715_s1 + $0xb0] sm:$0xff] }
  0x1d   : > { %s3440_s16 = sshll.u32 %s488_s27, 5  ;;  %3794 = vmatprep.subr.bf16.mxu1 %v4314_v13  ;;  %v3192_v50 = vld [vmem:[%s5715_s1 + $0xc8] sm:$0xff]  ;;  %v3194_v51 = vld [vmem:[%s5715_s1 + $0xd8] sm:$0xff]  ;;  %v3798_v52 = vpack.c.bf16 %v1119_v46, %v1118_v45  ;;  %v3773_v54 = vpack.c.bf16 %v3185_v49, %v3183_v48  ;;  %v1120_v55 = vld [vmem:[%s5717_s3 + $0x30] sm:$0xff]  ;;  %s3437_s27 = sshll.u32 %s4419_s22, 4 }
  0x1e   : > { %s4483_s25 = scalar_lea.vmem %s5745_s0, %s3440_s16  ;;  %v1121_v56 = vld [vmem:[%s5717_s3 + $0x38] sm:$0xff]  ;;  %v3775_v57 = vpack.c.bf16 %v3194_v51, %v3192_v50  ;;  %v1122_v60 = vld [vmem:[%s5717_s3 + $0x40] sm:$0xff]  ;;  %v1123_v61 = vld [vmem:[%s5717_s3 + $0x48] sm:$0xff]  ;;  %v1088_v51 = vlaneseq  ;;  %s486_s16 = scalar_lea.vmem [#allocation4], %s485_s29 }
  0x1f   : > { %v504_v21 = vld [vmem:[%s4483_s25 + $0x1] sm:$0xff]  ;;  %v505_v28 = vld [vmem:[%s4483_s25 + $0x9] sm:$0xff]  ;;  %v506_v31 = vld [vmem:[%s4483_s25 + $0x11] sm:$0xff]  ;;  %v3801_v58 = vpack.c.bf16 %v1121_v56, %v1120_v55  ;;  %v3804_v62 = vpack.c.bf16 %v1123_v61, %v1122_v60  ;;  %s3102_s17 = sshll.u32 %s486_s16, 4  ;;  %s5672_s23 = scalar_lea.hbm %s5729_s15, %s3437_s27  ;;  %s5674_s17 = int_to_ptr.vmem [resolvable:$true] %s3102_s17 }
  0x20   : > { %3171 = vmatmul.mubr.msk.f32.vlgmr.msra.gmra.mrb[0].mxu0 %vm517_vm0, %v504_v21  ;;  %v507_v32 = vld [vmem:[%s4483_s25 + $0x19] sm:$0xf]  ;;  %v492_v43 = vld [vmem:[%s4483_s25] sm:$0xff]  ;;  %3796 = vmatpush1.bf16.msra.mxu1 %v3795_v42  ;;  %v493_v53 = vld [vmem:[%s4483_s25 + $0x8] sm:$0xff]  ;;  %s3090_s0 = scalar_lea.sflag [#allocation5], %s485_s29  ;;  %s4249_s20 = scalar_lea.vmem %s5674_s17, 16 }
  0x21   : > { %600 = vmatprep.mubr.f32.mxu0 %v4313_v7  ;;  %3762 = vmatpush1.bf16.msra.mxu0 %v3761_v22  ;;  %v494_v59 = vld [vmem:[%s4483_s25 + $0x10] sm:$0xff]  ;;  %v495_v63 = vld [vmem:[%s4483_s25 + $0x18] sm:$0xf]  ;;  %v3191_v2 = vld [vmem:[%s5715_s1 + $0xc0] sm:$0xff]  ;;  %p4250_p11 = scmp.ne.s32.totalorder %s5674_s17, %s4249_s20  ;;  %s4317_s22 = smov [#allocation4]  }
  0x22   : > { %3764 = vmatprep.subr.bf16.mxu0 %v3763_v23  ;;  %3797 = vmatprep.subr.bf16.mxu1 %v4314_v13  ;;  %v1124_v0 = vld [vmem:[%s5717_s3 + $0x50] sm:$0xff]  ;;  %v1125_v1 = vld [vmem:[%s5717_s3 + $0x58] sm:$0xff]  ;;  %v3196_v4 = vld [vmem:[%s5715_s1 + $0xe8] sm:$0xff]  ;;  %s4253_s24 = sshll.u32 %s4317_s22, 4  ;;  %s4254_s24 = int_to_ptr.vmem [resolvable:$false] %s4253_s24 }
  0x23   : > { %v3193_v3 = vld [vmem:[%s5715_s1 + $0xd0] sm:$0xff]  ;;  %v3198_v5 = vld [vmem:[%s5715_s1 + $0xf8] sm:$0xff]  ;;  %v3807_v6 = vpack.c.bf16 %v1125_v1, %v1124_v0  ;;  %v720_v8 = vld [vmem:[%s4483_s25 + $0x2] sm:$0xff]  ;;  %p4251_p12 = pnand %p4250_p11, %p4436_p5  ;;  %s4255_s21 = scalar_lea.vmem %s4254_s24, 32 }
  0x24   : > { %3172 = vmatmul.mubr.msk.f32.gmra.mrb[2].mxu0 %vm517_vm0, %v505_v28  ;;  %3799 = vmatpush1.bf16.msra.mxu1 %v3798_v52  ;;  %v3777_v9 = vpack.c.bf16 %v3193_v3, %v3191_v2  ;;  %v1126_v10 = vld [vmem:[%s5717_s3 + $0x60] sm:$0xff]  ;;  %v1127_v11 = vld [vmem:[%s5717_s3 + $0x68] sm:$0xff]  ;;  %v3779_v12 = vpack.c.bf16 %v3198_v5, %v3196_v4  ;;  %v3197_v15 = vld [vmem:[%s5715_s1 + $0xf0] sm:$0xff]  ;;  %v4708_v52 = vshrl.u32 %v1088_v51, 7  ;;  %p4256_p0 = scmp.lt.s32.totalorder %s5674_s17, %s4254_s24  ;;  %p4257_p1 = scmp.lt.s32.totalorder %s4255_s21, %s4249_s20 }
  0x25   : > { %606 = vmatprep.mubr.f32.mxu0 %v4313_v7  ;;  %3766 = vmatpush1.bf16.msra.mxu0 %v3765_v29  ;;  %v3195_v14 = vld [vmem:[%s5715_s1 + $0xe0] sm:$0xff]  ;;  %v3204_v16 = vld [vmem:[%s5715_s1 + $0x108] sm:$0xff]  ;;  %v3206_v17 = vld [vmem:[%s5715_s1 + $0x118] sm:$0xff]  ;;  %v3810_v18 = vpack.c.bf16 %v1127_v11, %v1126_v10  ;;  %p4252_p13 = pneg %p4251_p12 }
  0x26   : > { %3768 = vmatprep.subr.bf16.mxu0 %v3767_v30  ;;  %3800 = vmatprep.subr.bf16.mxu1 %v4314_v13  ;;  %v721_v19 = vld [vmem:[%s4483_s25 + $0xa] sm:$0xff]  ;;  %v3781_v20 = vpack.c.bf16 %v3197_v15, %v3195_v14  ;;  %v1129_v22 = vld [vmem:[%s5717_s3 + $0x78] sm:$0xff]  ;;  %v3783_v23 = vpack.c.bf16 %v3206_v17, %v3204_v16  ;;  %v1130_v26 = vld [vmem:[%s5717_s3 + $0x80] sm:$0xff]  ;;  %v1094_v55 = vsub.s32 1, %v4708_v52  ;;  %p4258_p2 = por %p4257_p1, %p4256_p0 }
  0x27   : > { %v1128_v21 = vld [vmem:[%s5717_s3 + $0x70] sm:$0xff]  ;;  %v1131_v27 = vld [vmem:[%s5717_s3 + $0x88] sm:$0xff]  ;;  %v723_v29 = vld [vmem:[%s4483_s25 + $0x1a] sm:$0xf] }
  0x28   : > { %3173 = vmatmul.mubr.msk.f32.gmra.mrb[4].mxu0 %vm517_vm0, %v506_v31  ;;  %3802 = vmatpush1.bf16.msra.mxu1 %v3801_v58  ;;  %v3813_v24 = vpack.c.bf16 %v1129_v22, %v1128_v21  ;;  %v722_v25 = vld [vmem:[%s4483_s25 + $0x12] sm:$0xff]  ;;  %v3816_v28 = vpack.c.bf16 %v1131_v27, %v1130_v26  ;;  %v3203_v30 = vld [vmem:[%s5715_s1 + $0x100] sm:$0xff]  ;;  %v845_v42 = vld [vmem:[%s4483_s25 + $0x1b] sm:$0xf]  ;;  %p4259_p3 = pnand %p4258_p2, %p4252_p13 }
  0x29   : > { %612 = vmatprep.mubr.f32.mxu0 %v4313_v7  ;;  %3803 = vmatprep.subr.bf16.mxu1 %v4314_v13  ;;  %v3205_v31 = vld [vmem:[%s5715_s1 + $0x110] sm:$0xff]  ;;  %v3210_v33 = vld [vmem:[%s5715_s1 + $0x138] sm:$0xff]  ;;  %v842_v34 = vld [vmem:[%s4483_s25 + $0x3] sm:$0xff] }
  0x2a   : > { %v3785_v35 = vpack.c.bf16 %v3205_v31, %v3203_v30  ;;  %v3207_v37 = vld [vmem:[%s5715_s1 + $0x120] sm:$0xff]  ;;  %v3209_v38 = vld [vmem:[%s5715_s1 + $0x130] sm:$0xff]  ;;  %v967_v46 = vld [vmem:[%s4483_s25 + $0x1c] sm:$0xf] }
  0x2b   : > { %v843_v39 = vld [vmem:[%s4483_s25 + $0xb] sm:$0xff]  ;;  %v3789_v40 = vpack.c.bf16 %v3209_v38, %v3207_v37  ;;  %v844_v41 = vld [vmem:[%s4483_s25 + $0x13] sm:$0xff]  ;;  %v1134_v50 = vld [vmem:[%s5717_s3 + $0xa0] sm:$0xff] }
  0x2c   : > { %3174 = vmatmul.mubr.msk.f32.gmra.mrb[6].mxu0 %vm517_vm0, %v507_v32  ;;  %3805 = vmatpush1.bf16.msra.mxu1 %v3804_v62  ;;  %v3208_v32 = vld [vmem:[%s5715_s1 + $0x128] sm:$0xff]  ;;  %v966_v45 = vld [vmem:[%s4483_s25 + $0x14] sm:$0xff]  ;;  %v3226_v27 = vld [vmem:[%s5717_s3 + $0xe0] sm:$0xff] }
  0x2d   : > { %695 = vmatprep.mubr.f32.mxu0 %v4313_v7  ;;  %3806 = vmatprep.subr.bf16.mxu1 %v4314_v13  ;;  %v3787_v36 = vpack.c.bf16 %v3210_v33, %v3208_v32  ;;  %v1133_v48 = vld [vmem:[%s5717_s3 + $0x98] sm:$0xff]  ;;  %v3219_v61 = vld [vmem:[%s5717_s3 + $0xa8] sm:$0xff]  ;;  %v3220_v62 = vld [vmem:[%s5717_s3 + $0xb0] sm:$0xff] }
  0x2e   : > { %v3822_v2 = vpack.c.bf16 %v3220_v62, %v3219_v61  ;;  %v3223_v17 = vld [vmem:[%s5717_s3 + $0xc8] sm:$0xff]  ;;  %v3225_v26 = vld [vmem:[%s5717_s3 + $0xd8] sm:$0xff]  ;;  %v3228_v33 = vld [vmem:[%s5717_s3 + $0xf0] sm:$0xff] }
  0x2f   : > { %v3831_v30 = vpack.c.bf16 %v3226_v27, %v3225_v26  ;;  %v3227_v32 = vld [vmem:[%s5717_s3 + $0xe8] sm:$0xff]  ;;  %v1344_v51 = vld [vmem:[%s5718_s4] sm:$0xff]  ;;  %vm3856_vm5 = vmpackc.low %vm1353_vm3, %vm4315_vm4 }
  0x30   : > { %3175 = vmatmul.mubr.msk.f32.vlgmr.msra.gmra.mrb[0].mxu0 %vm517_vm0, %v492_v43  ;;  %3808 = vmatpush1.bf16.msra.mxu1 %v3807_v6  ;;  %v964_v43 = vld [vmem:[%s4483_s25 + $0x4] sm:$0xff]  ;;  %v3221_v6 = vld [vmem:[%s5717_s3 + $0xb8] sm:$0xff]  ;;  %v3256_v27 = vld [vmem:[%s5719_s5 + $0xd0] sm:$0xff] }
  0x31   : > { %701 = vmatprep.mubr.f32.mxu0 %v4313_v7  ;;  %3770 = vmatpush1.bf16.msra.mxu0 %v3769_v44  ;;  %v965_v44 = vld [vmem:[%s4483_s25 + $0xc] sm:$0xff]  ;;  %vm4033_vm10 = vmpackc.low %vm2327_vm9, %vm4315_vm4 }
  0x32   : > { %3772 = vmatprep.subr.bf16.mxu0 %v3771_v47  ;;  %3809 = vmatprep.subr.bf16.mxu1 %v4314_v13  ;;  %v1132_v47 = vld [vmem:[%s5717_s3 + $0x90] sm:$0xff]  ;;  %v3231_v38 = vld [vmem:[%s5717_s3 + $0x108] sm:$0xff] }
  0x33   : > { %v3819_v49 = vpack.c.bf16 %v1133_v48, %v1132_v47  ;;  %v3237_v47 = vld [vmem:[%s5717_s3 + $0x138] sm:$0xff]  ;;  %v3238_v48 = vld [vmem:[%s5717_s3 + $0x140] sm:$0xff] }
  0x34   : > { %3176 = vmatmul.mubr.msk.f32.gmra.mrb[2].mxu0 %vm517_vm0, %v493_v53  ;;  %3811 = vmatpush1.bf16.msra.mxu1 %v3810_v18  ;;  %v1090_v53 = vsub.s32 0, %v4708_v52  ;;  %v3224_v18 = vld [vmem:[%s5717_s3 + $0xd0] sm:$0xff] }
  0x35   : > { %707 = vmatprep.mubr.f32.mxu0 %v4313_v7  ;;  %3774 = vmatpush1.bf16.msra.mxu0 %v3773_v54  ;;  %v1086_v54 = vld [vmem:[%s5716_s2] sm:$0x3]  ;;  %v3828_v22 = vpack.c.bf16 %v3224_v18, %v3223_v17 }
  0x36   : > { %3776 = vmatprep.subr.bf16.mxu0 %v3775_v57  ;;  %3812 = vmatprep.subr.bf16.mxu1 %v4314_v13  ;;  %v1091_v56 = vrot.slane %v1086_v54, %v1090_v53  ;;  %v1095_v57 = vrot.slane %v1086_v54, %v1094_v55  ;;  %v3253_v54 = vld [vmem:[%s5719_s5 + $0xb8] sm:$0xff] }
  0x38   : > { %3177 = vmatmul.mubr.msk.f32.gmra.mrb[4].mxu0 %vm517_vm0, %v494_v59  ;;  %3814 = vmatpush1.bf16.msra.mxu1 %v3813_v24 }
  0x39   : > { %713 = vmatprep.mubr.f32.mxu0 %v4313_v7  ;;  %3815 = vmatprep.subr.bf16.mxu1 %v4314_v13 }
  0x3c   : > { %3178 = vmatmul.mubr.msk.f32.gmra.mrb[6].mxu0 %vm517_vm0, %v495_v63  ;;  %3817 = vmatpush1.bf16.msra.mxu1 %v3816_v28 }
  0x3d   : > { %809 = vmatprep.mubr.f32.mxu0 %v4313_v7  ;;  %3818 = vmatprep.subr.bf16.mxu1 %v4314_v13 }
  0x40   : > { %3187 = vmatmul.mubr.msk.f32.vlgmr.msra.gmra.mrb[0].mxu0 %vm517_vm0, %v720_v8  ;;  %3820 = vmatpush1.bf16.msra.mxu1 %v3819_v49  ;;  %v3222_v8 = vld [vmem:[%s5717_s3 + $0xc0] sm:$0xff]  ;;  %v3849_v49 = vpack.c.bf16 %v3238_v48, %v3237_v47  ;;  %v3273_v48 = vld [vmem:[%s5719_s5 + $0x158] sm:$0xf] }
  0x41   : > { %815 = vmatprep.mubr.f32.mxu0 %v4313_v7  ;;  %3778 = vmatpush1.bf16.msra.mxu0 %v3777_v9 }
  0x42   : > { %3780 = vmatprep.subr.bf16.mxu0 %v3779_v12  ;;  %1188 = vmatprep.subr.mxu1 %v4313_v7  ;;  %v3825_v12 = vpack.c.bf16 %v3222_v8, %v3221_v6 }
  0x44   : > { %3188 = vmatmul.mubr.msk.f32.gmra.mrb[2].mxu0 %vm517_vm0, %v721_v19  ;;  %1189 = vmatpush1.msra.mxu1 %v1134_v50  ;;  %v3239_v50 = vld [vmem:[%s5717_s3 + $0x148] sm:$0xff] }
  0x45   : > { %821 = vmatprep.mubr.f32.mxu0 %v4313_v7  ;;  %3782 = vmatpush1.bf16.msra.mxu0 %v3781_v20 }
  0x46   : > { %3784 = vmatprep.subr.bf16.mxu0 %v3783_v23  ;;  %3821 = vmatprep.subr.bf16.mxu1 %v4314_v13 }
  0x48   : > { %3189 = vmatmul.mubr.msk.f32.gmra.mrb[4].mxu0 %vm517_vm0, %v722_v25 }
  0x49   : > { %827 = vmatprep.mubr.f32.mxu0 %v4313_v7 }
  0x4c   : > { %3190 = vmatmul.mubr.msk.f32.gmra.mrb[6].mxu0 %vm517_vm0, %v723_v29 }
  0x4d   : > { %931 = vmatprep.mubr.f32.mxu0 %v4313_v7 }
  0x50   : > { %3199 = vmatmul.mubr.msk.f32.vlgmr.msra.gmra.mrb[0].mxu0 %vm517_vm0, %v842_v34  ;;  %v3834_v34 = vpack.c.bf16 %v3228_v33, %v3227_v32  ;;  %v3260_v32 = vld [vmem:[%s5719_s5 + $0xf0] sm:$0xff] }
  0x51   : > { %937 = vmatprep.mubr.f32.mxu0 %v4313_v7  ;;  %3786 = vmatpush1.bf16.msra.mxu0 %v3785_v35  ;;  %v3229_v35 = vld [vmem:[%s5717_s3 + $0xf8] sm:$0xff] }
  0x52   : > { %3788 = vmatprep.subr.bf16.mxu0 %v3787_v36  ;;  %v3230_v36 = vld [vmem:[%s5717_s3 + $0x100] sm:$0xff] }
  0x53   : > { %v3837_v37 = vpack.c.bf16 %v3230_v36, %v3229_v35  ;;  %v3265_v36 = vld [vmem:[%s5719_s5 + $0x118] sm:$0xff] }
  0x54   : > { %3200 = vmatmul.mubr.msk.f32.gmra.mrb[2].mxu0 %vm517_vm0, %v843_v39  ;;  %v3232_v39 = vld [vmem:[%s5717_s3 + $0x110] sm:$0xff] }
  0x55   : > { %943 = vmatprep.mubr.f32.mxu0 %v4313_v7  ;;  %3790 = vmatpush1.bf16.msra.mxu0 %v3789_v40  ;;  %v3840_v40 = vpack.c.bf16 %v3232_v39, %v3231_v38  ;;  %v3264_v39 = vld [vmem:[%s5719_s5 + $0x110] sm:$0xff] }
  0x58   : > { %3201 = vmatmul.mubr.msk.f32.gmra.mrb[4].mxu0 %vm517_vm0, %v844_v41  ;;  %v3233_v41 = vld [vmem:[%s5717_s3 + $0x118] sm:$0xff] }
  0x59   : > { %949 = vmatprep.mubr.f32.mxu0 %v4313_v7 }
  0x5c   : > { %3202 = vmatmul.mubr.msk.f32.gmra.mrb[6].mxu0 %vm517_vm0, %v845_v42  ;;  %v3234_v42 = vld [vmem:[%s5717_s3 + $0x120] sm:$0xff] }
  0x5d   : > { %1053 = vmatprep.mubr.f32.mxu0 %v4313_v7 }
  0x60   : > { %3211 = vmatmul.mubr.msk.f32.vlgmr.msra.gmra.mrb[0].mxu0 %vm517_vm0, %v964_v43  ;;  %v3843_v43 = vpack.c.bf16 %v3234_v42, %v3233_v41  ;;  %v3269_v42 = vld [vmem:[%s5719_s5 + $0x138] sm:$0xff] }
  0x61   : > { %1059 = vmatprep.mubr.f32.mxu0 %v4313_v7 }
  0x64   : > { %3212 = vmatmul.mubr.msk.f32.gmra.mrb[2].mxu0 %vm517_vm0, %v965_v44  ;;  %v3235_v44 = vld [vmem:[%s5717_s3 + $0x128] sm:$0xff] }
  0x65   : > { %1065 = vmatprep.mubr.f32.mxu0 %v4313_v7 }
  0x68   : > { %3213 = vmatmul.mubr.msk.f32.gmra.mrb[4].mxu0 %vm517_vm0, %v966_v45  ;;  %v3236_v45 = vld [vmem:[%s5717_s3 + $0x130] sm:$0xff] }
  0x69   : > { %1071 = vmatprep.mubr.f32.mxu0 %v4313_v7 }
  0x6c   : > { %3214 = vmatmul.mubr.msk.f32.gmra.mrb[6].mxu0 %vm517_vm0, %v967_v46  ;;  %v3846_v46 = vpack.c.bf16 %v3236_v45, %v3235_v44  ;;  %v3268_v45 = vld [vmem:[%s5719_s5 + $0x130] sm:$0xff] }
  0x6d   : > { %3550 = vmatprep.mubr.msk.f32.mxu0 %vm1346_vm2, %v1344_v51  ;;  %v3272_v51 = vld [vmem:[%s5719_s5 + $0x150] sm:$0xf] }
 0x133   : > { %v1055_v58 = vpop.f32.mrb[0].mxu0 }
 0x134   : > { %v4719_v59 = vadd.f32 %v1091_v56, %v1055_v58  ;;  %v1057_v60 = vpop.f32.mrb[1].mxu0 }
 0x135   : > { %v1099_v63 = vadd.f32 %v1095_v57, %v1057_v60 }
 0x136   : > { %v1106_v3 = vmax.f32 %v4719_v59, 0.0  ;;  %v3254_v59 = vld [vmem:[%s5719_s5 + $0xc0] sm:$0xff] }
 0x137   : > { %v1107_v0 = vmax.f32 %v1099_v63, 0.0  ;;  %v1061_v1 = vpop.f32.mrb[2].mxu0 }
 0x138   : > { %v4728_v4 = vadd.f32 %v1091_v56, %v1061_v1  ;;  %v1063_v5 = vpop.f32.mrb[3].mxu0 }
 0x139   : > { %v4736_v9 = vadd.f32 %v1095_v57, %v1063_v5  ;;  %3215 = vmatprep.mubr.msk.f32.mxu1 %vm1135_vm1, %v1107_v0 }
 0x13a   : > { %1213 = vmatmul.mubr.f32.vlgmr.msra.gmra.mrb[0].mxu1 %v1106_v3  ;;  %v1108_v14 = vmax.f32 %v4728_v4, 0.0 }
 0x13b   : > { %v1109_v10 = vmax.f32 %v4736_v9, 0.0  ;;  %3823 = vmatpush1.bf16.msra.mxu1 %v3822_v2  ;;  %v1067_v11 = vpop.f32.mrb[4].mxu0 }
 0x13c   : > { %v4743_v15 = vadd.f32 %v1091_v56, %v1067_v11  ;;  %v1069_v16 = vpop.f32.mrb[5].mxu0  ;;  %3824 = vmatprep.subr.bf16.mxu1 %v4314_v13 }
 0x13d   : > { %v1103_v19 = vadd.f32 %v1095_v57, %v1069_v16  ;;  %3216 = vmatprep.mubr.msk.f32.mxu1 %vm1135_vm1, %v1109_v10 }
 0x13e   : > { %1218 = vmatmul.mubr.f32.gmra.mrb[2].mxu1 %v1108_v14  ;;  %v1110_v23 = vmax.f32 %v4743_v15, 0.0 }
 0x13f   : > { %v1111_v20 = vmax.f32 %v1103_v19, 0.0  ;;  %3826 = vmatpush1.bf16.msra.mxu1 %v3825_v12  ;;  %v1073_v21 = vpop.f32.mrb[6].mxu0 }
 0x140   : > { %v1104_v24 = vadd.f32 %v1091_v56, %v1073_v21  ;;  %v1075_v25 = vpop.f32.mrb[7].mxu0  ;;  %3827 = vmatprep.subr.bf16.mxu1 %v4314_v13  ;;  %v3255_v56 = vld [vmem:[%s5719_s5 + $0xc8] sm:$0xff] }
 0x141   : > { %v1105_v28 = vadd.f32 %v1095_v57, %v1075_v25  ;;  %3217 = vmatprep.mubr.msk.f32.mxu1 %vm1135_vm1, %v1111_v20  ;;  %v3252_v57 = vld [vmem:[%s5719_s5 + $0xb0] sm:$0xff]  ;;  %v3871_v58 = vpack.c.bf16 %v3255_v56, %v3253_v54  ;;  %v1345_v21 = vld [vmem:[%s5718_s4 + $0x8] sm:$0x3f]  ;;  %v2123_v56 = vld [vmem:[%s5721_s7] sm:$0xff] }
 0x142   : > { %1223 = vmatmul.mubr.f32.gmra.mrb[4].mxu1 %v1110_v23  ;;  %v1112_v31 = vmax.f32 %v1104_v24, 0.0  ;;  %v3873_v60 = vpack.c.bf16 %v3254_v59, %v3252_v57  ;;  %v3257_v24 = vld [vmem:[%s5719_s5 + $0xd8] sm:$0xff]  ;;  %v3259_v25 = vld [vmem:[%s5719_s5 + $0xe8] sm:$0xff] }
 0x143   : > { %v1113_v29 = vmax.f32 %v1105_v28, 0.0  ;;  %3829 = vmatpush1.bf16.msra.mxu1 %v3828_v22  ;;  %v3247_v22 = vld [vmem:[%s5718_s4 + $0x10] sm:$0xff]  ;;  %v3875_v26 = vpack.c.bf16 %v3259_v25, %v3257_v24  ;;  %v3258_v28 = vld [vmem:[%s5719_s5 + $0xe0] sm:$0xff]  ;;  %v2124_v57 = vld [vmem:[%s5721_s7 + $0x8] sm:$0xff] }
 0x144   : > { %3830 = vmatprep.subr.bf16.mxu1 %v4314_v13  ;;  %v3972_v59 = vpack.c.bf16 %v2124_v57, %v2123_v56  ;;  %v2139_v24 = vld [vmem:[%s5721_s7 + $0x80] sm:$0xff]  ;;  %v2140_v25 = vld [vmem:[%s5721_s7 + $0x88] sm:$0xff]  ;;  %v1542_v57 = vld [vmem:[%s5719_s5 + $0x90] sm:$0xff] }
 0x145   : > { %3218 = vmatprep.mubr.msk.f32.mxu1 %vm1135_vm1, %v1113_v29  ;;  %v1540_v56 = vld [vmem:[%s5719_s5 + $0x80] sm:$0xff] }
 0x146   : > { %1228 = vmatmul.mubr.f32.gmra.mrb[6].mxu1 %v1112_v31 }
 0x147   : > { %3832 = vmatpush1.bf16.msra.mxu1 %v3831_v30  ;;  %3240 = vmatprep.mubr.msk.f32.mxu1 %vm1135_vm1, %v1107_v0  ;;  %v3261_v30 = vld [vmem:[%s5719_s5 + $0xf8] sm:$0xff] }
 0x148   : > { %3833 = vmatprep.subr.bf16.mxu1 %v4314_v13 }
 0x14b   : > { %3835 = vmatpush1.bf16.msra.mxu1 %v3834_v34  ;;  %v3262_v34 = vld [vmem:[%s5719_s5 + $0x100] sm:$0xff] }
 0x14c   : > { %3836 = vmatprep.subr.bf16.mxu1 %v4314_v13  ;;  %v3881_v35 = vpack.c.bf16 %v3262_v34, %v3260_v32  ;;  %v1530_v34 = vld [vmem:[%s5719_s5 + $0x30] sm:$0xff] }
 0x14f   : > { %3838 = vmatpush1.bf16.msra.mxu1 %v3837_v37  ;;  %v3267_v37 = vld [vmem:[%s5719_s5 + $0x128] sm:$0xff] }
 0x150   : > { %3839 = vmatprep.subr.bf16.mxu1 %v4314_v13  ;;  %v3883_v38 = vpack.c.bf16 %v3267_v37, %v3265_v36  ;;  %v1533_v36 = vld [vmem:[%s5719_s5 + $0x48] sm:$0xff]  ;;  %v1535_v37 = vld [vmem:[%s5719_s5 + $0x58] sm:$0xff] }
 0x153   : > { %3841 = vmatpush1.bf16.msra.mxu1 %v3840_v40  ;;  %v3266_v40 = vld [vmem:[%s5719_s5 + $0x120] sm:$0xff] }
 0x154   : > { %3842 = vmatprep.subr.bf16.mxu1 %v4314_v13  ;;  %v3885_v41 = vpack.c.bf16 %v3266_v40, %v3264_v39  ;;  %v3899_v39 = vpack.c.bf16 %v1535_v37, %v1533_v36  ;;  %v1532_v40 = vld [vmem:[%s5719_s5 + $0x40] sm:$0xff]  ;;  %v3313_v36 = vld [vmem:[%s5719_s5 + $0x238] sm:$0xff]  ;;  %v3315_v37 = vld [vmem:[%s5719_s5 + $0x248] sm:$0xff] }
 0x157   : > { %3844 = vmatpush1.bf16.msra.mxu1 %v3843_v43  ;;  %v3271_v43 = vld [vmem:[%s5719_s5 + $0x148] sm:$0xff] }
 0x158   : > { %3845 = vmatprep.subr.bf16.mxu1 %v4314_v13  ;;  %v3887_v44 = vpack.c.bf16 %v3271_v43, %v3269_v42  ;;  %v1537_v43 = vld [vmem:[%s5719_s5 + $0x68] sm:$0xff] }
 0x15b   : > { %3847 = vmatpush1.bf16.msra.mxu1 %v3846_v46  ;;  %v3270_v46 = vld [vmem:[%s5719_s5 + $0x140] sm:$0xff] }
 0x15c   : > { %3848 = vmatprep.subr.bf16.mxu1 %v4314_v13  ;;  %v3889_v47 = vpack.c.bf16 %v3270_v46, %v3268_v45 }
 0x15f   : > { %3850 = vmatpush1.bf16.msra.mxu1 %v3849_v49  ;;  %v1525_v49 = vld [vmem:[%s5719_s5 + $0x8] sm:$0xff] }
 0x160   : > { %1295 = vmatprep.subr.mxu1 %v4313_v7 }
 0x163   : > { %1296 = vmatpush1.msra.mxu1 %v3239_v50  ;;  %v1527_v50 = vld [vmem:[%s5719_s5 + $0x18] sm:$0xff] }
 0x164   : > { %1320 = vmatmul.mubr.f32.vlgmr.msra.gmra.mrb[8].mxu1 %v1106_v3  ;;  %3872 = vmatprep.subr.bf16.mxu1 %v3871_v58  ;;  %v3891_v54 = vpack.c.bf16 %v1527_v50, %v1525_v49  ;;  %v2125_v58 = vld [vmem:[%s5721_s7 + $0x10] sm:$0xff]  ;;  %v1541_v49 = vld [vmem:[%s5719_s5 + $0x88] sm:$0xff]  ;;  %v1543_v50 = vld [vmem:[%s5719_s5 + $0x98] sm:$0xff] }
 0x165   : > { %3241 = vmatprep.mubr.msk.f32.mxu1 %vm1135_vm1, %v1109_v10  ;;  %3874 = vmatpush1.bf16.msra.mxu1 %v3873_v60  ;;  %v2126_v60 = vld [vmem:[%s5721_s7 + $0x18] sm:$0xff] }
 0x166   : > { %3876 = vmatprep.subr.bf16.mxu1 %v3875_v26  ;;  %v1524_v26 = vld [vmem:[%s5719_s5] sm:$0xff] }
 0x168   : > { %1325 = vmatmul.mubr.f32.gmra.mrb[10].mxu1 %v1108_v14 }
 0x169   : > { %3242 = vmatprep.mubr.msk.f32.mxu1 %vm1135_vm1, %v1111_v20 }
 0x16c   : > { %1330 = vmatmul.mubr.f32.gmra.mrb[12].mxu1 %v1110_v23  ;;  %v3248_v23 = vld [vmem:[%s5718_s4 + $0x18] sm:$0x3f] }
 0x16d   : > { %3243 = vmatprep.mubr.msk.f32.mxu1 %vm1135_vm1, %v1113_v29  ;;  %v3877_v29 = vpack.c.bf16 %v3258_v28, %v3256_v27  ;;  %v1526_v27 = vld [vmem:[%s5719_s5 + $0x10] sm:$0xff]  ;;  %v1529_v28 = vld [vmem:[%s5719_s5 + $0x28] sm:$0xff] }
 0x16f   : > { %3878 = vmatpush1.bf16.msra.mxu1 %v3877_v29  ;;  %v1531_v29 = vld [vmem:[%s5719_s5 + $0x38] sm:$0xff] }
 0x170   : > { %1335 = vmatmul.mubr.f32.gmra.mrb[14].mxu1 %v1112_v31  ;;  %v3263_v31 = vld [vmem:[%s5719_s5 + $0x108] sm:$0xff]  ;;  %v3895_v32 = vpack.c.bf16 %v1531_v29, %v1529_v28  ;;  %v3298_v28 = vld [vmem:[%s5719_s5 + $0x1e0] sm:$0xff]  ;;  %v3300_v29 = vld [vmem:[%s5719_s5 + $0x1f0] sm:$0xff] }
 0x171   : > { %1647 = vmatprep.mubr.f32.mxu1 %v4313_v7  ;;  %v3879_v33 = vpack.c.bf16 %v3263_v31, %v3261_v30  ;;  %v3996_v30 = vpack.c.bf16 %v2140_v25, %v2139_v24  ;;  %v3893_v31 = vpack.c.bf16 %v1526_v27, %v1524_v26  ;;  %v3299_v24 = vld [vmem:[%s5719_s5 + $0x1e8] sm:$0xff]  ;;  %v3301_v25 = vld [vmem:[%s5719_s5 + $0x1f8] sm:$0xff] }
 0x172   : > { %v3927_v27 = vpack.c.bf16 %v3301_v25, %v3299_v24  ;;  %v3342_v24 = vld [vmem:[%s5719_s5 + $0x300] sm:$0xff]  ;;  %v3344_v25 = vld [vmem:[%s5719_s5 + $0x310] sm:$0xff] }
 0x173   : > { %3880 = vmatprep.subr.bf16.mxu1 %v3879_v33  ;;  %v1528_v33 = vld [vmem:[%s5719_s5 + $0x20] sm:$0xff] }
 0x174   : > { %3882 = vmatpush1.bf16.msra.mxu1 %v3881_v35 }
 0x175   : > { %3884 = vmatprep.subr.bf16.mxu1 %v3883_v38  ;;  %v3897_v38 = vpack.c.bf16 %v1530_v34, %v1528_v33  ;;  %v3311_v33 = vld [vmem:[%s5719_s5 + $0x228] sm:$0xff]  ;;  %v3308_v34 = vld [vmem:[%s5719_s5 + $0x210] sm:$0xff] }
 0x178   : > { %3886 = vmatpush1.bf16.msra.mxu1 %v3885_v41  ;;  %v1534_v41 = vld [vmem:[%s5719_s5 + $0x50] sm:$0xff] }
 0x179   : > { %3888 = vmatprep.subr.bf16.mxu1 %v3887_v44  ;;  %v1539_v44 = vld [vmem:[%s5719_s5 + $0x78] sm:$0xff]  ;;  %v3901_v45 = vpack.c.bf16 %v1534_v41, %v1532_v40  ;;  %v3935_v41 = vpack.c.bf16 %v3315_v37, %v3313_v36  ;;  %v3350_v37 = vld [vmem:[%s5719_s5 + $0x340] sm:$0xff] }
 0x17a   : > { %v3903_v46 = vpack.c.bf16 %v1539_v44, %v1537_v43  ;;  %v3314_v43 = vld [vmem:[%s5719_s5 + $0x240] sm:$0xff] }
 0x17c   : > { %3890 = vmatpush1.bf16.msra.mxu1 %v3889_v47  ;;  %v1536_v47 = vld [vmem:[%s5719_s5 + $0x60] sm:$0xff] }
 0x17d   : > { %3274 = vmatprep.subr.msk.mxu1 %vm1353_vm3, %v3273_v48  ;;  %v1538_v48 = vld [vmem:[%s5719_s5 + $0x70] sm:$0xff] }
 0x180   : > { %3275 = vmatpush1.msk.msra.mxu1 %vm1353_vm3, %v3272_v51  ;;  %v3905_v51 = vpack.c.bf16 %v1538_v48, %v1536_v47 }
 0x181   : > { %3892 = vmatprep.subr.bf16.mxu1 %v3891_v54  ;;  %v3907_v54 = vpack.c.bf16 %v1543_v50, %v1541_v49  ;;  %v3316_v49 = vld [vmem:[%s5719_s5 + $0x250] sm:$0xff]  ;;  %v3318_v50 = vld [vmem:[%s5719_s5 + $0x260] sm:$0xff] }
 0x20d   : > { %v1214_v61 = vpop.f32.mrb[0].mxu1 }
 0x20e   : > { %v1216_v62 = vpop.f32.mrb[1].mxu1 }
 0x20f   : > { %v2127_v62 = vld [vmem:[%s5721_s7 + $0x20] sm:$0xff] }
 0x211   : > { %v1219_v63 = vpop.f32.mrb[2].mxu1 }
 0x212   : > { %v1221_v0 = vpop.f32.mrb[3].mxu1 }
 0x215   : > { %v1224_v1 = vpop.f32.mrb[4].mxu1 }
 0x216   : > { %v1226_v2 = vpop.f32.mrb[5].mxu1 }
 0x217   : > { %v2130_v2 = vld [vmem:[%s5721_s7 + $0x38] sm:$0xff] }
 0x219   : > { %v1229_v3 = vpop.f32.mrb[6].mxu1 }
 0x21a   : > { %v1231_v4 = vpop.f32.mrb[7].mxu1 }
 0x21b   : > { %v2131_v4 = vld [vmem:[%s5721_s7 + $0x40] sm:$0xff] }
 0x237   : > { %v1321_v5 = vpop.f32.mrb[8].mxu1 }
 0x238   : > { %v1340_v6 = vmax.f32 %v1214_v61, %v1321_v5  ;;  %v1323_v8 = vpop.f32.mrb[9].mxu1  ;;  %v3975_v61 = vpack.c.bf16 %v2126_v60, %v2125_v58  ;;  %v2132_v5 = vld [vmem:[%s5721_s7 + $0x48] sm:$0xff]  ;;  %v3909_v58 = vpack.c.bf16 %v1542_v57, %v1540_v56  ;;  %v3941_v57 = vpack.c.bf16 %v3318_v50, %v3316_v49 }
 0x239   : > { %v3283_v60 = vld [vmem:[%s5719_s5 + $0x168] sm:$0xff] }
 0x23a   : > { %v3323_v56 = vld [vmem:[%s5719_s5 + $0x288] sm:$0xff] }
 0x23b   : > { %v1326_v9 = vpop.f32.mrb[10].mxu1 }
 0x23c   : > { %v1341_v10 = vmax.f32 %v1219_v63, %v1326_v9  ;;  %v1328_v11 = vpop.f32.mrb[11].mxu1  ;;  %v2128_v63 = vld [vmem:[%s5721_s7 + $0x28] sm:$0xff]  ;;  %v2133_v9 = vld [vmem:[%s5721_s7 + $0x50] sm:$0xff] }
 0x23d   : > { %v3978_v0 = vpack.c.bf16 %v2128_v63, %v2127_v62  ;;  %v3282_v62 = vld [vmem:[%s5719_s5 + $0x160] sm:$0xff]  ;;  %v3284_v63 = vld [vmem:[%s5719_s5 + $0x170] sm:$0xff] }
 0x23e   : > { %v3851_v12 = vpack.c.bf16 %v1341_v10, %v1340_v6  ;;  %v3984_v6 = vpack.c.bf16 %v2132_v5, %v2131_v4  ;;  %v2134_v10 = vld [vmem:[%s5721_s7 + $0x58] sm:$0xff]  ;;  %v3913_v4 = vpack.c.bf16 %v3284_v63, %v3282_v62  ;;  %v3327_v62 = vld [vmem:[%s5719_s5 + $0x2a8] sm:$0xff] }
 0x23f   : > { %v1331_v14 = vpop.f32.mrb[12].mxu1 }
 0x240   : > { %v1342_v15 = vmax.f32 %v1224_v1, %v1331_v14  ;;  %v1333_v16 = vpop.f32.mrb[13].mxu1  ;;  %3852 = vmatprep.subr.bf16.mxu0 %v3851_v12  ;;  %v2129_v1 = vld [vmem:[%s5721_s7 + $0x30] sm:$0xff]  ;;  %v2135_v14 = vld [vmem:[%s5721_s7 + $0x60] sm:$0xff] }
 0x241   : > { %3854 = vmatpush3.bf16.msra.mxu0 %v3851_v12 }
 0x243   : > { %v1336_v17 = vpop.f32.mrb[14].mxu1 }
 0x244   : > { %v1343_v18 = vmax.f32 %v1229_v3, %v1336_v17  ;;  %v1338_v19 = vpop.f32.mrb[15].mxu1  ;;  %v3981_v3 = vpack.c.bf16 %v2130_v2, %v2129_v1  ;;  %v3289_v1 = vld [vmem:[%s5719_s5 + $0x198] sm:$0xff]  ;;  %v1544_v2 = vld [vmem:[%s5719_s5 + $0xa0] sm:$0xf] }
 0x245   : > { %v2138_v19 = vld [vmem:[%s5721_s7 + $0x78] sm:$0xff] }
 0x246   : > { %v3855_v20 = vpack.c.bf16 %v1343_v18, %v1342_v15  ;;  %v2136_v15 = vld [vmem:[%s5721_s7 + $0x68] sm:$0xff]  ;;  %v2137_v18 = vld [vmem:[%s5721_s7 + $0x70] sm:$0xff] }
 0x247   : > { %v3990_v16 = vpack.c.bf16 %v2136_v15, %v2135_v14  ;;  %v3290_v15 = vld [vmem:[%s5719_s5 + $0x1a0] sm:$0xff] }
 0x248   : > { %3857 = vmatprep.subr.msk.bf16.mxu0 %vm3856_vm5, %v3855_v20 }
 0x249   : > { %3860 = vmatpush3.bf16.msk.msra.mxu0 %vm3856_vm5, %v3855_v20 }
 0x24a   : > { %3862 = vmatprep.subr.bf16.mxu0 %v3851_v12 }
 0x24c   : > { %3551 = vmatmul.mubr.msk.f32.vlgmr.msra.gmra.mrb[8].mxu0 %vm1346_vm2, %v1345_v21 }
 0x24d   : > { %3864 = vmatpush3.bf16.msra.mxu0 %v3851_v12  ;;  %3561 = vmatprep.mubr.msk.f32.mxu0 %vm1346_vm2, %v3247_v22  ;;  %v3987_v12 = vpack.c.bf16 %v2134_v10, %v2133_v9  ;;  %v3291_v10 = vld [vmem:[%s5719_s5 + $0x1a8] sm:$0xff] }
 0x24e   : > { %3867 = vmatprep.subr.msk.bf16.mxu0 %vm3856_vm5, %v3855_v20 }
 0x251   : > { %3870 = vmatpush3.bf16.msk.msra.mxu0 %vm3856_vm5, %v3855_v20 }
 0x252   : > { %3971 = vmatprep.subr.bf16.mxu0 %v4314_v13 }
 0x254   : > { %3562 = vmatmul.mubr.msk.f32.vlgmr.msra.gmra.mrb[10].mxu0 %vm1346_vm2, %v3248_v23  ;;  %v3993_v23 = vpack.c.bf16 %v2138_v19, %v2137_v18  ;;  %v3295_v18 = vld [vmem:[%s5719_s5 + $0x1c8] sm:$0xff]  ;;  %v3297_v19 = vld [vmem:[%s5719_s5 + $0x1d8] sm:$0xff] }
 0x255   : > { %3973 = vmatpush1.bf16.msra.mxu0 %v3972_v59  ;;  %v1545_v59 = vld [vmem:[%s5719_s5 + $0xa8] sm:$0xf] }
 0x256   : > { %3974 = vmatprep.subr.bf16.mxu0 %v4314_v13 }
 0x259   : > { %3976 = vmatpush1.bf16.msra.mxu0 %v3975_v61  ;;  %v3285_v61 = vld [vmem:[%s5719_s5 + $0x178] sm:$0xff] }
 0x25a   : > { %3977 = vmatprep.subr.bf16.mxu0 %v4314_v13 }
 0x25d   : > { %3979 = vmatpush1.bf16.msra.mxu0 %v3978_v0  ;;  %v3287_v0 = vld [vmem:[%s5719_s5 + $0x188] sm:$0xff] }
 0x25e   : > { %3980 = vmatprep.subr.bf16.mxu0 %v4314_v13  ;;  %v3915_v5 = vpack.c.bf16 %v3289_v1, %v3287_v0  ;;  %v3324_v1 = vld [vmem:[%s5719_s5 + $0x290] sm:$0xff] }
 0x261   : > { %3982 = vmatpush1.bf16.msra.mxu0 %v3981_v3  ;;  %v3911_v3 = vpack.c.bf16 %v3285_v61, %v3283_v60  ;;  %v3322_v60 = vld [vmem:[%s5719_s5 + $0x280] sm:$0xff]  ;;  %v3325_v61 = vld [vmem:[%s5719_s5 + $0x298] sm:$0xff] }
 0x262   : > { %3983 = vmatprep.subr.bf16.mxu0 %v4314_v13  ;;  %v3947_v0 = vpack.c.bf16 %v3327_v62, %v3325_v61  ;;  %v3364_v62 = vld [vmem:[%s5721_s7 + $0xb0] sm:$0xff] }
 0x265   : > { %3985 = vmatpush1.bf16.msra.mxu0 %v3984_v6  ;;  %v3286_v6 = vld [vmem:[%s5719_s5 + $0x180] sm:$0xff] }
 0x266   : > { %3986 = vmatprep.subr.bf16.mxu0 %v4314_v13 }
 0x269   : > { %3988 = vmatpush1.bf16.msra.mxu0 %v3987_v12 }
 0x26a   : > { %3989 = vmatprep.subr.bf16.mxu0 %v4314_v13 }
 0x26d   : > { %3991 = vmatpush1.bf16.msra.mxu0 %v3990_v16  ;;  %v3292_v16 = vld [vmem:[%s5719_s5 + $0x1b0] sm:$0xff] }
 0x26e   : > { %3992 = vmatprep.subr.bf16.mxu0 %v4314_v13 }
 0x271   : > { %3994 = vmatpush1.bf16.msra.mxu0 %v3993_v23  ;;  %v3296_v23 = vld [vmem:[%s5719_s5 + $0x1d0] sm:$0xff] }
 0x272   : > { %3995 = vmatprep.subr.bf16.mxu0 %v4314_v13 }
 0x275   : > { %3997 = vmatpush1.bf16.msra.mxu0 %v3996_v30  ;;  %v3929_v30 = vpack.c.bf16 %v3300_v29, %v3298_v28  ;;  %v3349_v28 = vld [vmem:[%s5719_s5 + $0x338] sm:$0xff]  ;;  %v3961_v29 = vpack.c.bf16 %v3344_v25, %v3342_v24  ;;  %v3378_v24 = vld [vmem:[%s5721_s7 + $0x120] sm:$0xff]  ;;  %v3379_v25 = vld [vmem:[%s5721_s7 + $0x128] sm:$0xff] }
 0x276   : > { %3998 = vmatprep.subr.bf16.mxu0 %v4314_v13 }
 0x31f   : > { %v3552_v8 = vpop.f32.mrb[8].mxu0 }
 0x320   : > { %v1423_v11 = vpop.f32.mrb[9].mxu0 }
 0x327   : > { %v3563_v17 = vpop.f32.mrb[10].mxu0 }
 0x328   : > { %v1517_v20 = vmax.f32 %v3552_v8, %v3563_v17  ;;  %v1507_v21 = vpop.f32.mrb[11].mxu0  ;;  %v3288_v8 = vld [vmem:[%s5719_s5 + $0x190] sm:$0xff] }
 0x329   : > { %v1516_v22 = vmax.f32 %v1423_v11, %v1507_v21  ;;  %v3293_v11 = vld [vmem:[%s5719_s5 + $0x1b8] sm:$0xff]  ;;  %v3917_v12 = vpack.c.bf16 %v3288_v8, %v3286_v6  ;;  %v3923_v21 = vpack.c.bf16 %v3297_v19, %v3295_v18  ;;  %v3334_v8 = vld [vmem:[%s5719_s5 + $0x2c0] sm:$0xff]  ;;  %v3340_v18 = vld [vmem:[%s5719_s5 + $0x2f0] sm:$0xff] }
 0x32a   : > { %1521 = vst.msk [vmem:[#allocation2 + $0x8] sm:$0x3f] %vm1520_vm6, %v1517_v20  ;;  %v3919_v14 = vpack.c.bf16 %v3293_v11, %v3291_v10  ;;  %v3921_v20 = vpack.c.bf16 %v3292_v16, %v3290_v15  ;;  %v3337_v6 = vld [vmem:[%s5719_s5 + $0x2d8] sm:$0xff]  ;;  %v3339_v10 = vld [vmem:[%s5719_s5 + $0x2e8] sm:$0xff] }
 0x32b   : > { %1519 = vst.msk [vmem:[#allocation2] sm:$0xff] %vm1518_vm7, %v1516_v22  ;;  %v3294_v22 = vld [vmem:[%s5719_s5 + $0x1c0] sm:$0xff]  ;;  %v3341_v11 = vld [vmem:[%s5719_s5 + $0x2f8] sm:$0xff] }
 0x32c   : > { %v3925_v26 = vpack.c.bf16 %v3296_v23, %v3294_v22  ;;  %v3955_v16 = vpack.c.bf16 %v3341_v11, %v3339_v10  ;;  %v3370_v11 = vld [vmem:[%s5721_s7 + $0xe0] sm:$0xff] }
 0x331   : > { %v1547_v42 = vld [vmem:[#allocation2 + $0x9] sm:$0x3] }
 0x332   : > { %v1546_v35 = vld [vmem:[#allocation2 + $0x1] sm:$0xff] }
 0x333   : > { %3276 = vmatmul.mubr.msk.f32.vlgmr.msra.gmra.mrb[16].mxu1 %vm1518_vm7, %v1546_v35  ;;  %v1522_v9 = vld [vmem:[#allocation2] sm:$0xff]  ;;  %v1523_v17 = vld [vmem:[#allocation2 + $0x8] sm:$0x3] }
 0x334   : > { %3894 = vmatpush1.bf16.msra.mxu1 %v3893_v31  ;;  %1653 = vmatprep.mubr.f32.mxu1 %v4313_v7  ;;  %v3303_v31 = vld [vmem:[%s5719_s5 + $0x208] sm:$0xf]  ;;  %v3310_v35 = vld [vmem:[%s5719_s5 + $0x220] sm:$0xff] }
 0x335   : > { %3896 = vmatprep.subr.bf16.mxu1 %v3895_v32  ;;  %v3309_v32 = vld [vmem:[%s5719_s5 + $0x218] sm:$0xff]  ;;  %v3933_v40 = vpack.c.bf16 %v3310_v35, %v3308_v34  ;;  %v1749_v44 = vld [vmem:[#allocation2 + $0x2] sm:$0xff] }
 0x336   : > { %v1867_v19 = vld [vmem:[#allocation2 + $0x3] sm:$0xff]  ;;  %v3353_v34 = vld [vmem:[%s5719_s5 + $0x358] sm:$0xff] }
 0x337   : > { %3277 = vmatmul.mubr.msk.f32.gmra.mrb[18].mxu1 %vm1518_vm7, %v1547_v42  ;;  %v3312_v42 = vld [vmem:[%s5719_s5 + $0x230] sm:$0xff] }
 0x338   : > { %3898 = vmatpush1.bf16.msra.mxu1 %v3897_v38  ;;  %1736 = vmatprep.mubr.f32.mxu1 %v4313_v7  ;;  %v3302_v38 = vld [vmem:[%s5719_s5 + $0x200] sm:$0xf]  ;;  %v3937_v47 = vpack.c.bf16 %v3314_v43, %v3312_v42  ;;  %v1985_v42 = vld [vmem:[#allocation2 + $0x4] sm:$0xff]  ;;  %v1986_v43 = vld [vmem:[#allocation2 + $0xc] sm:$0x3] }
 0x339   : > { %3900 = vmatprep.subr.bf16.mxu1 %v3899_v39  ;;  %v3931_v39 = vpack.c.bf16 %v3311_v33, %v3309_v32  ;;  %v3348_v32 = vld [vmem:[%s5719_s5 + $0x330] sm:$0xff]  ;;  %v3351_v33 = vld [vmem:[%s5719_s5 + $0x348] sm:$0xff] }
 0x33a   : > { %v3967_v36 = vpack.c.bf16 %v3353_v34, %v3351_v33  ;;  %v2483_v33 = vld [vmem:[%s5723_s9 + $0x10] sm:$0xff]  ;;  %v2484_v34 = vld [vmem:[%s5723_s9 + $0x18] sm:$0xff] }
 0x33c   : > { %3902 = vmatpush1.bf16.msra.mxu1 %v3901_v45  ;;  %v3317_v45 = vld [vmem:[%s5719_s5 + $0x258] sm:$0xff] }
 0x33d   : > { %3904 = vmatprep.subr.bf16.mxu1 %v3903_v46  ;;  %v3319_v46 = vld [vmem:[%s5719_s5 + $0x268] sm:$0xff] }
 0x33e   : > { %v3939_v48 = vpack.c.bf16 %v3319_v46, %v3317_v45  ;;  %v2142_v45 = vld [vmem:[%s5721_s7 + $0x98] sm:$0xff] }
 0x340   : > { %3906 = vmatpush1.bf16.msra.mxu1 %v3905_v51  ;;  %v1750_v51 = vld [vmem:[#allocation2 + $0xa] sm:$0x3] }
 0x341   : > { %3908 = vmatprep.subr.bf16.mxu1 %v3907_v54  ;;  %v3321_v54 = vld [vmem:[%s5719_s5 + $0x278] sm:$0xff] }
 0x344   : > { %3910 = vmatpush1.bf16.msra.mxu1 %v3909_v58  ;;  %v3943_v58 = vpack.c.bf16 %v3323_v56, %v3321_v54  ;;  %v3362_v56 = vld [vmem:[%s5721_s7 + $0xa0] sm:$0xff] }
 0x345   : > { %3278 = vmatprep.subr.msk.mxu1 %vm1353_vm3, %v1545_v59  ;;  %v3320_v59 = vld [vmem:[%s5719_s5 + $0x270] sm:$0xff] }
 0x346   : > { %v3945_v63 = vpack.c.bf16 %v3322_v60, %v3320_v59 }
 0x348   : > { %3279 = vmatpush1.msk.msra.mxu1 %vm1353_vm3, %v1544_v2  ;;  %v3326_v2 = vld [vmem:[%s5719_s5 + $0x2a0] sm:$0xff] }
 0x349   : > { %3280 = vmatmul.mubr.msk.f32.vlgmr.msra.gmra.mrb[16].mxu1 %vm1518_vm7, %v1522_v9  ;;  %3912 = vmatprep.subr.bf16.mxu1 %v3911_v3  ;;  %v3949_v3 = vpack.c.bf16 %v3326_v2, %v3324_v1  ;;  %v3336_v9 = vld [vmem:[%s5719_s5 + $0x2d0] sm:$0xff] }
 0x34a   : > { %3914 = vmatpush1.bf16.msra.mxu1 %v3913_v4  ;;  %1742 = vmatprep.mubr.f32.mxu1 %v4313_v7  ;;  %v3329_v4 = vld [vmem:[%s5719_s5 + $0x2b8] sm:$0xf]  ;;  %v3953_v15 = vpack.c.bf16 %v3336_v9, %v3334_v8  ;;  %v3368_v8 = vld [vmem:[%s5721_s7 + $0xd0] sm:$0xff] }
 0x34b   : > { %3916 = vmatprep.subr.bf16.mxu1 %v3915_v5  ;;  %v3335_v5 = vld [vmem:[%s5719_s5 + $0x2c8] sm:$0xff]  ;;  %v3369_v9 = vld [vmem:[%s5721_s7 + $0xd8] sm:$0xff] }
 0x34c   : > { %v4011_v10 = vpack.c.bf16 %v3369_v9, %v3368_v8  ;;  %v2490_v8 = vld [vmem:[%s5723_s9 + $0x48] sm:$0xff] }
 0x34d   : > { %3281 = vmatmul.mubr.msk.f32.gmra.mrb[18].mxu1 %vm1518_vm7, %v1523_v17  ;;  %v3338_v17 = vld [vmem:[%s5719_s5 + $0x2e0] sm:$0xff] }
 0x34e   : > { %3918 = vmatpush1.bf16.msra.mxu1 %v3917_v12  ;;  %1850 = vmatprep.mubr.f32.mxu1 %v4313_v7  ;;  %v3328_v12 = vld [vmem:[%s5719_s5 + $0x2b0] sm:$0xf]  ;;  %v3957_v22 = vpack.c.bf16 %v3340_v18, %v3338_v17  ;;  %v3374_v18 = vld [vmem:[%s5721_s7 + $0x100] sm:$0xff] }
 0x34f   : > { %3920 = vmatprep.subr.bf16.mxu1 %v3919_v14  ;;  %v3951_v14 = vpack.c.bf16 %v3337_v6, %v3335_v5  ;;  %v3367_v5 = vld [vmem:[%s5721_s7 + $0xc8] sm:$0xff] }
 0x352   : > { %3922 = vmatpush1.bf16.msra.mxu1 %v3921_v20  ;;  %v3343_v20 = vld [vmem:[%s5719_s5 + $0x308] sm:$0xff] }
 0x353   : > { %3924 = vmatprep.subr.bf16.mxu1 %v3923_v21  ;;  %v3345_v21 = vld [vmem:[%s5719_s5 + $0x318] sm:$0xff] }
 0x354   : > { %v3959_v23 = vpack.c.bf16 %v3345_v21, %v3343_v20  ;;  %v3376_v21 = vld [vmem:[%s5721_s7 + $0x110] sm:$0xff] }
 0x356   : > { %3926 = vmatpush1.bf16.msra.mxu1 %v3925_v26  ;;  %v1868_v26 = vld [vmem:[#allocation2 + $0xb] sm:$0x3] }
 0x357   : > { %3928 = vmatprep.subr.bf16.mxu1 %v3927_v27  ;;  %v3347_v27 = vld [vmem:[%s5719_s5 + $0x328] sm:$0xff] }
 0x35a   : > { %3930 = vmatpush1.bf16.msra.mxu1 %v3929_v30  ;;  %v3963_v30 = vpack.c.bf16 %v3349_v28, %v3347_v27  ;;  %v3380_v27 = vld [vmem:[%s5721_s7 + $0x130] sm:$0xff]  ;;  %v3381_v28 = vld [vmem:[%s5721_s7 + $0x138] sm:$0xff] }
 0x35b   : > { %3304 = vmatprep.subr.msk.mxu1 %vm1353_vm3, %v3303_v31  ;;  %v3346_v31 = vld [vmem:[%s5719_s5 + $0x320] sm:$0xff] }
 0x35c   : > { %v3965_v35 = vpack.c.bf16 %v3348_v32, %v3346_v31  ;;  %v2482_v31 = vld [vmem:[%s5723_s9 + $0x8] sm:$0xff] }
 0x35e   : > { %3305 = vmatpush1.msk.msra.mxu1 %vm1353_vm3, %v3302_v38  ;;  %v3352_v38 = vld [vmem:[%s5719_s5 + $0x350] sm:$0xff] }
 0x35f   : > { %3306 = vmatmul.mubr.msk.f32.vlgmr.msra.gmra.mrb[16].mxu1 %vm1518_vm7, %v1749_v44  ;;  %3932 = vmatprep.subr.bf16.mxu1 %v3931_v39  ;;  %v3969_v39 = vpack.c.bf16 %v3352_v38, %v3350_v37  ;;  %v2141_v44 = vld [vmem:[%s5721_s7 + $0x90] sm:$0xff] }
 0x360   : > { %3934 = vmatpush1.bf16.msra.mxu1 %v3933_v40  ;;  %1856 = vmatprep.mubr.f32.mxu1 %v4313_v7  ;;  %v3355_v40 = vld [vmem:[%s5719_s5 + $0x368] sm:$0xf]  ;;  %v3999_v46 = vpack.c.bf16 %v2142_v45, %v2141_v44 }
 0x361   : > { %3936 = vmatprep.subr.bf16.mxu1 %v3935_v41  ;;  %v3354_v41 = vld [vmem:[%s5719_s5 + $0x360] sm:$0xf] }
 0x362   : > { %4000 = vmatpush1.bf16.msra.mxu0 %v3999_v46 }
 0x363   : > { %3307 = vmatmul.mubr.msk.f32.gmra.mrb[18].mxu1 %vm1518_vm7, %v1750_v51  ;;  %4001 = vmatprep.subr.bf16.mxu0 %v4314_v13 }
 0x364   : > { %3938 = vmatpush1.bf16.msra.mxu1 %v3937_v47  ;;  %1968 = vmatprep.mubr.f32.mxu1 %v4313_v7  ;;  %v2103_v47 = vld [vmem:[%s5720_s6] sm:$0x3] }
 0x365   : > { %3940 = vmatprep.subr.bf16.mxu1 %v3939_v48  ;;  %v2108_v48 = vrot.slane %v2103_v47, %v1090_v53  ;;  %v2112_v49 = vrot.slane %v2103_v47, %v1094_v55  ;;  %v2322_v47 = vld [vmem:[%s5722_s8] sm:$0x1f] }
 0x368   : > { %3942 = vmatpush1.bf16.msra.mxu1 %v3941_v57  ;;  %v3363_v57 = vld [vmem:[%s5721_s7 + $0xa8] sm:$0xff] }
 0x369   : > { %3944 = vmatprep.subr.bf16.mxu1 %v3943_v58  ;;  %v4002_v61 = vpack.c.bf16 %v3363_v57, %v3362_v56  ;;  %v3393_v56 = vld [vmem:[%s5723_s9 + $0x68] sm:$0xff] }
 0x36c   : > { %3946 = vmatpush1.bf16.msra.mxu1 %v3945_v63  ;;  %v3365_v63 = vld [vmem:[%s5721_s7 + $0xb8] sm:$0xff] }
 0x36d   : > { %3948 = vmatprep.subr.bf16.mxu1 %v3947_v0  ;;  %v4005_v2 = vpack.c.bf16 %v3365_v63, %v3364_v62  ;;  %v3397_v62 = vld [vmem:[%s5723_s9 + $0x88] sm:$0xff] }
 0x370   : > { %3950 = vmatpush1.bf16.msra.mxu1 %v3949_v3 }
 0x371   : > { %3330 = vmatprep.subr.msk.mxu1 %vm1353_vm3, %v3329_v4  ;;  %v3366_v4 = vld [vmem:[%s5721_s7 + $0xc0] sm:$0xff] }
 0x372   : > { %v4008_v6 = vpack.c.bf16 %v3367_v5, %v3366_v4  ;;  %v3399_v4 = vld [vmem:[%s5723_s9 + $0x98] sm:$0xff]  ;;  %v2489_v5 = vld [vmem:[%s5723_s9 + $0x40] sm:$0xff] }
 0x373   : > { %v4052_v9 = vpack.c.bf16 %v2490_v8, %v2489_v5 }
 0x374   : > { %3331 = vmatpush1.msk.msra.mxu1 %vm1353_vm3, %v3328_v12  ;;  %v3371_v12 = vld [vmem:[%s5721_s7 + $0xe8] sm:$0xff] }
 0x375   : > { %3332 = vmatmul.mubr.msk.f32.vlgmr.msra.gmra.mrb[16].mxu1 %vm1518_vm7, %v1867_v19  ;;  %3952 = vmatprep.subr.bf16.mxu1 %v3951_v14  ;;  %v4014_v14 = vpack.c.bf16 %v3371_v12, %v3370_v11  ;;  %v3375_v19 = vld [vmem:[%s5721_s7 + $0x108] sm:$0xff] }
 0x376   : > { %3954 = vmatpush1.bf16.msra.mxu1 %v3953_v15  ;;  %1974 = vmatprep.mubr.f32.mxu1 %v4313_v7  ;;  %v3372_v15 = vld [vmem:[%s5721_s7 + $0xf0] sm:$0xff]  ;;  %v4020_v20 = vpack.c.bf16 %v3375_v19, %v3374_v18 }
 0x377   : > { %3956 = vmatprep.subr.bf16.mxu1 %v3955_v16  ;;  %v3373_v16 = vld [vmem:[%s5721_s7 + $0xf8] sm:$0xff]  ;;  %v3403_v19 = vld [vmem:[%s5723_s9 + $0xb0] sm:$0xff] }
 0x378   : > { %v4017_v17 = vpack.c.bf16 %v3373_v16, %v3372_v15  ;;  %v3401_v16 = vld [vmem:[%s5723_s9 + $0xa0] sm:$0xff] }
 0x379   : > { %3333 = vmatmul.mubr.msk.f32.gmra.mrb[18].mxu1 %vm1518_vm7, %v1868_v26  ;;  %v4026_v26 = vpack.c.bf16 %v3379_v25, %v3378_v24  ;;  %v3405_v24 = vld [vmem:[%s5723_s9 + $0xc0] sm:$0xff]  ;;  %v3406_v25 = vld [vmem:[%s5723_s9 + $0xc8] sm:$0xff] }
 0x37a   : > { %3958 = vmatpush1.bf16.msra.mxu1 %v3957_v22  ;;  %2086 = vmatprep.mubr.f32.mxu1 %v4313_v7  ;;  %v3377_v22 = vld [vmem:[%s5721_s7 + $0x118] sm:$0xff] }
 0x37b   : > { %3960 = vmatprep.subr.bf16.mxu1 %v3959_v23  ;;  %v4023_v23 = vpack.c.bf16 %v3377_v22, %v3376_v21 }
 0x37e   : > { %3962 = vmatpush1.bf16.msra.mxu1 %v3961_v29  ;;  %v4029_v29 = vpack.c.bf16 %v3381_v28, %v3380_v27  ;;  %v3407_v27 = vld [vmem:[%s5723_s9 + $0xd0] sm:$0xff]  ;;  %v3408_v28 = vld [vmem:[%s5723_s9 + $0xd8] sm:$0xff] }
 0x37f   : > { %3964 = vmatprep.subr.bf16.mxu1 %v3963_v30  ;;  %v2481_v30 = vld [vmem:[%s5723_s9] sm:$0xff] }
 0x380   : > { %v4040_v32 = vpack.c.bf16 %v2482_v31, %v2481_v30  ;;  %v3409_v30 = vld [vmem:[%s5723_s9 + $0xe0] sm:$0xff]  ;;  %v3410_v31 = vld [vmem:[%s5723_s9 + $0xe8] sm:$0xff] }
 0x382   : > { %3966 = vmatpush1.bf16.msra.mxu1 %v3965_v35  ;;  %v4043_v35 = vpack.c.bf16 %v2484_v34, %v2483_v33  ;;  %v3412_v33 = vld [vmem:[%s5723_s9 + $0xf0] sm:$0xff]  ;;  %v3413_v34 = vld [vmem:[%s5723_s9 + $0xf8] sm:$0xff] }
 0x383   : > { %3968 = vmatprep.subr.bf16.mxu1 %v3967_v36 }
 0x386   : > { %3970 = vmatpush1.bf16.msra.mxu1 %v3969_v39 }
 0x387   : > { %3356 = vmatprep.subr.msk.mxu1 %vm1353_vm3, %v3355_v40 }
 0x38a   : > { %3357 = vmatpush1.msk.msra.mxu1 %vm1353_vm3, %v3354_v41 }
 0x38b   : > { %3358 = vmatmul.mubr.msk.f32.vlgmr.msra.gmra.mrb[16].mxu1 %vm1518_vm7, %v1985_v42  ;;  %4039 = vmatprep.subr.bf16.mxu1 %v4314_v13 }
 0x38c   : > { %2092 = vmatprep.mubr.f32.mxu1 %v4313_v7  ;;  %4041 = vmatpush3.bf16.msra.mxu1 %v4040_v32  ;;  %v4082_v32 = vpack.c.bf16 %v3410_v31, %v3409_v30  ;;  %v3001_v30 = vld [vmem:[%s5727_s13 + $0x8] sm:$0xff] }
 0x38d   : > { %4042 = vmatprep.subr.bf16.mxu1 %v4314_v13 }
 0x38f   : > { %3359 = vmatmul.mubr.msk.f32.gmra.mrb[18].mxu1 %vm1518_vm7, %v1986_v43 }
 0x390   : > { %3598 = vmatprep.mubr.msk.f32.mxu1 %vm4316_vm8, %v4313_v7  ;;  %4044 = vmatpush3.bf16.msra.mxu1 %v4043_v35  ;;  %v4085_v35 = vpack.c.bf16 %v3413_v34, %v3412_v33 }
 0x391   : > { %4045 = vmatprep.subr.bf16.mxu1 %v4314_v13 }
 0x45e   : > { %v2088_v50 = vpop.f32.mrb[16].mxu1 }
 0x45f   : > { %v5282_v51 = vadd.f32 %v2108_v48, %v2088_v50  ;;  %v2090_v54 = vpop.f32.mrb[17].mxu1  ;;  %v3386_v50 = vld [vmem:[%s5722_s8 + $0x8] sm:$0x1f] }
 0x460   : > { %v2116_v58 = vadd.f32 %v2112_v49, %v2090_v54  ;;  %v3392_v54 = vld [vmem:[%s5723_s9 + $0x60] sm:$0xff] }
 0x461   : > { %v2119_v53 = vmax.f32 %v5282_v51, 0.0  ;;  %v4058_v57 = vpack.c.bf16 %v3393_v56, %v3392_v54  ;;  %v3425_v54 = vld [vmem:[%s5723_s9 + $0x150] sm:$0xff]  ;;  %v3426_v56 = vld [vmem:[%s5723_s9 + $0x158] sm:$0xff] }
 0x462   : > { %v2120_v59 = vmax.f32 %v2116_v58, 0.0  ;;  %v2094_v60 = vpop.f32.mrb[18].mxu1  ;;  %v3394_v58 = vld [vmem:[%s5723_s9 + $0x70] sm:$0xff] }
 0x463   : > { %v2117_v52 = vadd.f32 %v2108_v48, %v2094_v60  ;;  %v2096_v55 = vpop.f32.mrb[19].mxu1  ;;  %v3390_v48 = vld [vmem:[%s5723_s9 + $0x50] sm:$0xff] }
 0x464   : > { %v2118_v0 = vadd.f32 %v2112_v49, %v2096_v55  ;;  %3360 = vmatprep.mubr.msk.f32.mxu0 %vm517_vm0, %v2120_v59  ;;  %v3391_v49 = vld [vmem:[%s5723_s9 + $0x58] sm:$0xff]  ;;  %v3396_v55 = vld [vmem:[%s5723_s9 + $0x80] sm:$0xff] }
 0x465   : > { %2214 = vmatmul.mubr.f32.vlgmr.msra.gmra.mrb[12].mxu0 %v2119_v53  ;;  %v2121_v3 = vmax.f32 %v2117_v52, 0.0  ;;  %v4055_v51 = vpack.c.bf16 %v3391_v49, %v3390_v48  ;;  %v4064_v63 = vpack.c.bf16 %v3397_v62, %v3396_v55  ;;  %v3423_v49 = vld [vmem:[%s5723_s9 + $0x140] sm:$0xff] }
 0x466   : > { %v2122_v1 = vmax.f32 %v2118_v0, 0.0  ;;  %4003 = vmatpush1.bf16.msra.mxu0 %v4002_v61  ;;  %v2485_v61 = vld [vmem:[%s5723_s9 + $0x20] sm:$0xff]  ;;  %v2487_v0 = vld [vmem:[%s5723_s9 + $0x30] sm:$0xff] }
 0x467   : > { %4004 = vmatprep.subr.bf16.mxu0 %v4314_v13  ;;  %v3431_v62 = vld [vmem:[%s5723_s9 + $0x180] sm:$0xff] }
 0x468   : > { %3361 = vmatprep.mubr.msk.f32.mxu0 %vm517_vm0, %v2122_v1 }
 0x469   : > { %2219 = vmatmul.mubr.f32.gmra.mrb[14].mxu0 %v2121_v3 }
 0x46a   : > { %4006 = vmatpush1.bf16.msra.mxu0 %v4005_v2  ;;  %3382 = vmatprep.mubr.msk.f32.mxu0 %vm517_vm0, %v2120_v59  ;;  %v3395_v59 = vld [vmem:[%s5723_s9 + $0x78] sm:$0xff] }
 0x46b   : > { %4007 = vmatprep.subr.bf16.mxu0 %v4314_v13  ;;  %v4061_v60 = vpack.c.bf16 %v3395_v59, %v3394_v58  ;;  %v4103_v58 = vpack.c.bf16 %v3426_v56, %v3425_v54  ;;  %v3427_v59 = vld [vmem:[%s5723_s9 + $0x160] sm:$0xff] }
 0x46e   : > { %4009 = vmatpush1.bf16.msra.mxu0 %v4008_v6 }
 0x46f   : > { %4010 = vmatprep.subr.bf16.mxu0 %v4314_v13 }
 0x472   : > { %4012 = vmatpush1.bf16.msra.mxu0 %v4011_v10 }
 0x473   : > { %4013 = vmatprep.subr.bf16.mxu0 %v4314_v13 }
 0x476   : > { %4015 = vmatpush1.bf16.msra.mxu0 %v4014_v14 }
 0x477   : > { %4016 = vmatprep.subr.bf16.mxu0 %v4314_v13 }
 0x47a   : > { %4018 = vmatpush1.bf16.msra.mxu0 %v4017_v17  ;;  %v3402_v17 = vld [vmem:[%s5723_s9 + $0xa8] sm:$0xff] }
 0x47b   : > { %4019 = vmatprep.subr.bf16.mxu0 %v4314_v13  ;;  %v4070_v18 = vpack.c.bf16 %v3402_v17, %v3401_v16  ;;  %v2918_v16 = vld [vmem:[%s5725_s11 + $0x40] sm:$0xff]  ;;  %v2919_v17 = vld [vmem:[%s5725_s11 + $0x48] sm:$0xff] }
 0x47e   : > { %4021 = vmatpush1.bf16.msra.mxu0 %v4020_v20  ;;  %v3404_v20 = vld [vmem:[%s5723_s9 + $0xb8] sm:$0xff] }
 0x47f   : > { %4022 = vmatprep.subr.bf16.mxu0 %v4314_v13 }
 0x482   : > { %4024 = vmatpush1.bf16.msra.mxu0 %v4023_v23  ;;  %v4073_v23 = vpack.c.bf16 %v3404_v20, %v3403_v19  ;;  %v2920_v19 = vld [vmem:[%s5725_s11 + $0x50] sm:$0xff]  ;;  %v2921_v20 = vld [vmem:[%s5725_s11 + $0x58] sm:$0xff] }
 0x483   : > { %4025 = vmatprep.subr.bf16.mxu0 %v4314_v13 }
 0x486   : > { %4027 = vmatpush1.bf16.msra.mxu0 %v4026_v26  ;;  %v4076_v26 = vpack.c.bf16 %v3406_v25, %v3405_v24  ;;  %v2924_v25 = vld [vmem:[%s5725_s11 + $0x70] sm:$0xff] }
 0x487   : > { %4028 = vmatprep.subr.bf16.mxu0 %v4314_v13 }
 0x48a   : > { %4030 = vmatpush1.bf16.msra.mxu0 %v4029_v29  ;;  %v4079_v29 = vpack.c.bf16 %v3408_v28, %v3407_v27  ;;  %v2479_v28 = vld [vmem:[%s5724_s10] sm:$0x1] }
 0x48b   : > { %4031 = vmatprep.subr.bf16.mxu0 %v4314_v13 }
 0x48d   : > { %2310 = vmatmul.mubr.f32.vlgmr.msra.gmra.mrb[16].mxu0 %v2119_v53  ;;  %v2486_v53 = vld [vmem:[%s5723_s9 + $0x28] sm:$0xff] }
 0x48e   : > { %3383 = vmatprep.mubr.msk.f32.mxu0 %vm517_vm0, %v2122_v1  ;;  %v4046_v52 = vpack.c.bf16 %v2486_v53, %v2485_v61  ;;  %v2488_v1 = vld [vmem:[%s5723_s9 + $0x38] sm:$0xff]  ;;  %v3429_v53 = vld [vmem:[%s5723_s9 + $0x170] sm:$0xff] }
 0x48f   : > { %v4049_v2 = vpack.c.bf16 %v2488_v1, %v2487_v0 }
 0x490   : > { %4047 = vmatpush3.bf16.msra.mxu1 %v4046_v52  ;;  %v3430_v52 = vld [vmem:[%s5723_s9 + $0x178] sm:$0xff] }
 0x491   : > { %2315 = vmatmul.mubr.f32.gmra.mrb[18].mxu0 %v2121_v3  ;;  %4048 = vmatprep.subr.bf16.mxu1 %v4314_v13  ;;  %v3398_v3 = vld [vmem:[%s5723_s9 + $0x90] sm:$0xff]  ;;  %v4109_v55 = vpack.c.bf16 %v3430_v52, %v3429_v53 }
 0x492   : > { %3568 = vmatprep.mubr.msk.f32.mxu0 %vm4316_vm8, %v4313_v7  ;;  %v4067_v6 = vpack.c.bf16 %v3399_v4, %v3398_v3  ;;  %v2911_v3 = vld [vmem:[%s5725_s11 + $0x8] sm:$0xff]  ;;  %v2912_v4 = vld [vmem:[%s5725_s11 + $0x10] sm:$0xff] }
 0x494   : > { %4050 = vmatpush3.bf16.msra.mxu1 %v4049_v2  ;;  %v2910_v2 = vld [vmem:[%s5725_s11] sm:$0xff] }
 0x495   : > { %4051 = vmatprep.subr.bf16.mxu1 %v4314_v13  ;;  %v4115_v5 = vpack.c.bf16 %v2911_v3, %v2910_v2 }
 0x498   : > { %4053 = vmatpush3.bf16.msra.mxu1 %v4052_v9  ;;  %v2914_v9 = vld [vmem:[%s5725_s11 + $0x20] sm:$0xff] }
 0x499   : > { %4114 = vmatprep.subr.bf16.mxu1 %v4314_v13 }
 0x538   : > { %v2215_v36 = vpop.f32.mrb[12].mxu0 }
 0x539   : > { %v2217_v37 = vpop.f32.mrb[13].mxu0 }
 0x53a   : > { %v3415_v37 = vld [vmem:[%s5723_s9 + $0x108] sm:$0xff] }
 0x53c   : > { %v2220_v38 = vpop.f32.mrb[14].mxu0 }
 0x53d   : > { %v2222_v39 = vpop.f32.mrb[15].mxu0 }
 0x560   : > { %v2311_v40 = vpop.f32.mrb[16].mxu0 }
 0x561   : > { %v2320_v41 = vmax.f32 %v2215_v36, %v2311_v40  ;;  %v2313_v42 = vpop.f32.mrb[17].mxu0  ;;  %v3414_v36 = vld [vmem:[%s5723_s9 + $0x100] sm:$0xff]  ;;  %v3416_v40 = vld [vmem:[%s5723_s9 + $0x110] sm:$0xff] }
 0x562   : > { %v4088_v39 = vpack.c.bf16 %v3415_v37, %v3414_v36  ;;  %v3002_v36 = vld [vmem:[%s5727_s13 + $0x10] sm:$0xff]  ;;  %v3003_v37 = vld [vmem:[%s5727_s13 + $0x18] sm:$0xff] }
 0x564   : > { %v2316_v43 = vpop.f32.mrb[18].mxu0 }
 0x565   : > { %v2321_v44 = vmax.f32 %v2220_v38, %v2316_v43  ;;  %v2318_v45 = vpop.f32.mrb[19].mxu0  ;;  %v3418_v43 = vld [vmem:[%s5723_s9 + $0x120] sm:$0xff] }
 0x567   : > { %v4032_v46 = vpack.c.bf16 %v2321_v44, %v2320_v41  ;;  %v3417_v41 = vld [vmem:[%s5723_s9 + $0x118] sm:$0xff]  ;;  %v3419_v44 = vld [vmem:[%s5723_s9 + $0x128] sm:$0xff] }
 0x568   : > { %v4091_v42 = vpack.c.bf16 %v3417_v41, %v3416_v40  ;;  %v4094_v45 = vpack.c.bf16 %v3419_v44, %v3418_v43  ;;  %v3005_v40 = vld [vmem:[%s5727_s13 + $0x28] sm:$0xff]  ;;  %v3007_v43 = vld [vmem:[%s5727_s13 + $0x38] sm:$0xff] }
 0x569   : > { %4034 = vmatpush3.bf16.msk.msra.mxu0 %vm4033_vm10, %v4032_v46 }
 0x56a   : > { %4035 = vmatprep.subr.bf16.mxu0 %v4314_v13 }
 0x56c   : > { %3569 = vmatmul.mubr.msk.f32.vlgmr.msra.gmra.mrb[20].mxu0 %vm2323_vm11, %v2322_v47  ;;  %v3421_v47 = vld [vmem:[%s5723_s9 + $0x138] sm:$0xff] }
 0x56d   : > { %4038 = vmatpush3.bf16.msk.msra.mxu0 %vm4033_vm10, %v4032_v46  ;;  %3575 = vmatprep.mubr.msk.f32.mxu0 %vm4316_vm8, %v4313_v7  ;;  %v3420_v46 = vld [vmem:[%s5723_s9 + $0x130] sm:$0xff] }
 0x56e   : > { %4054 = vmatprep.subr.bf16.mxu0 %v4314_v13  ;;  %v4097_v48 = vpack.c.bf16 %v3421_v47, %v3420_v46  ;;  %v3009_v46 = vld [vmem:[%s5727_s13 + $0x48] sm:$0xff] }
 0x570   : > { %3576 = vmatmul.mubr.msk.f32.vlgmr.msra.gmra.mrb[22].mxu0 %vm2323_vm11, %v3386_v50  ;;  %v3424_v50 = vld [vmem:[%s5723_s9 + $0x148] sm:$0xff] }
 0x571   : > { %4056 = vmatpush3.bf16.msra.mxu0 %v4055_v51  ;;  %3621 = vmatprep.mubr.msk.f32.mxu0 %vm4316_vm8, %v4313_v7  ;;  %v4100_v51 = vpack.c.bf16 %v3424_v50, %v3423_v49  ;;  %v2925_v49 = vld [vmem:[%s5726_s12] sm:$0x1] }
 0x572   : > { %4057 = vmatprep.subr.bf16.mxu0 %v4314_v13 }
 0x575   : > { %4059 = vmatpush3.bf16.msra.mxu0 %v4058_v57 }
 0x576   : > { %4060 = vmatprep.subr.bf16.mxu0 %v4314_v13 }
 0x579   : > { %4062 = vmatpush3.bf16.msra.mxu0 %v4061_v60  ;;  %v3428_v60 = vld [vmem:[%s5723_s9 + $0x168] sm:$0xff] }
 0x57a   : > { %4063 = vmatprep.subr.bf16.mxu0 %v4314_v13  ;;  %v4106_v61 = vpack.c.bf16 %v3428_v60, %v3427_v59 }
 0x57d   : > { %4065 = vmatpush3.bf16.msra.mxu0 %v4064_v63  ;;  %v3432_v63 = vld [vmem:[%s5723_s9 + $0x188] sm:$0xff] }
 0x57e   : > { %4066 = vmatprep.subr.bf16.mxu0 %v4314_v13  ;;  %v4112_v0 = vpack.c.bf16 %v3432_v63, %v3431_v62 }
 0x581   : > { %4068 = vmatpush3.bf16.msra.mxu0 %v4067_v6  ;;  %v2913_v6 = vld [vmem:[%s5725_s11 + $0x18] sm:$0xff] }
 0x582   : > { %4069 = vmatprep.subr.bf16.mxu0 %v4314_v13  ;;  %v4118_v8 = vpack.c.bf16 %v2913_v6, %v2912_v4 }
 0x63f   : > { %v2397_v10 = vpop.f32.mrb[20].mxu0 }
 0x640   : > { %v3570_v11 = vpop.f32.mrb[21].mxu0 }
 0x643   : > { %v2472_v12 = vpop.f32.mrb[22].mxu0 }
 0x644   : > { %v2476_v14 = vmax.f32 %v2397_v10, %v2472_v12  ;;  %v3577_v15 = vpop.f32.mrb[23].mxu0  ;;  %v2915_v10 = vld [vmem:[%s5725_s11 + $0x28] sm:$0xff]  ;;  %v2916_v12 = vld [vmem:[%s5725_s11 + $0x30] sm:$0xff] }
 0x645   : > { %v4121_v11 = vpack.c.bf16 %v2915_v10, %v2914_v9 }
 0x646   : > { %2478 = vst.msk [vmem:[#allocation3] sm:$0x1f] %vm2477_vm12, %v2476_v14  ;;  %v2917_v14 = vld [vmem:[%s5725_s11 + $0x38] sm:$0xff] }
 0x647   : > { %v4124_v15 = vpack.c.bf16 %v2917_v14, %v2916_v12 }
 0x64d   : > { %v2480_v21 = vld [vmem:[#allocation3] sm:$0x1]  ;;  %v2566_v22 = vld [vmem:[#allocation3 + $0x1] sm:$0x1]  ;;  %v2652_v38 = vld [vmem:[#allocation3 + $0x2] sm:$0x1] }
 0x64e   : > { %3599 = vmatmul.mubr.msk.f32.vlgmr.msra.gmra.mrb[20].mxu1 %vm2491_vm13, %v2480_v21  ;;  %3622 = vmatmul.mubr.msk.f32.vlgmr.msra.gmra.mrb[24].mxu0 %vm2491_vm13, %v2566_v22  ;;  %v2738_v57 = vld [vmem:[#allocation3 + $0x3] sm:$0x1]  ;;  %v2824_v1 = vld [vmem:[#allocation3 + $0x4] sm:$0x1]  ;;  %v4130_v21 = vpack.c.bf16 %v2921_v20, %v2920_v19  ;;  %v2922_v22 = vld [vmem:[%s5725_s11 + $0x60] sm:$0xff] }
 0x64f   : > { %4071 = vmatpush3.bf16.msra.mxu0 %v4070_v18  ;;  %3644 = vmatprep.mubr.msk.f32.mxu0 %vm4316_vm8, %v4313_v7  ;;  %v4127_v18 = vpack.c.bf16 %v2919_v17, %v2918_v16 }
 0x650   : > { %4072 = vmatprep.subr.bf16.mxu0 %v4314_v13  ;;  %3723 = vmatprep.mubr.msk.f32.mxu1 %vm4316_vm8, %v4313_v7 }
 0x651   : > { %4116 = vmatpush3.bf16.msra.mxu1 %v4115_v5 }
 0x652   : > { %4117 = vmatprep.subr.bf16.mxu1 %v4314_v13 }
 0x653   : > { %4074 = vmatpush3.bf16.msra.mxu0 %v4073_v23  ;;  %v2923_v23 = vld [vmem:[%s5725_s11 + $0x68] sm:$0xff] }
 0x654   : > { %4075 = vmatprep.subr.bf16.mxu0 %v4314_v13  ;;  %v4133_v24 = vpack.c.bf16 %v2923_v23, %v2922_v22 }
 0x655   : > { %4119 = vmatpush3.bf16.msra.mxu1 %v4118_v8 }
 0x656   : > { %4120 = vmatprep.subr.bf16.mxu1 %v4314_v13 }
 0x657   : > { %4077 = vmatpush3.bf16.msra.mxu0 %v4076_v26 }
 0x658   : > { %4078 = vmatprep.subr.bf16.mxu0 %v4314_v13 }
 0x659   : > { %4122 = vmatpush3.bf16.msra.mxu1 %v4121_v11 }
 0x65a   : > { %4123 = vmatprep.subr.bf16.mxu1 %v4314_v13 }
 0x65b   : > { %4080 = vmatpush3.bf16.msra.mxu0 %v4079_v29  ;;  %v3000_v29 = vld [vmem:[%s5727_s13] sm:$0xff] }
 0x65c   : > { %4081 = vmatprep.subr.bf16.mxu0 %v4314_v13  ;;  %v4136_v33 = vpack.c.bf16 %v3001_v30, %v3000_v29 }
 0x65d   : > { %4125 = vmatpush3.bf16.msra.mxu1 %v4124_v15 }
 0x65e   : > { %4126 = vmatprep.subr.bf16.mxu1 %v4314_v13 }
 0x65f   : > { %4083 = vmatpush3.bf16.msra.mxu0 %v4082_v32 }
 0x660   : > { %4084 = vmatprep.subr.bf16.mxu0 %v4314_v13 }
 0x661   : > { %4128 = vmatpush3.bf16.msra.mxu1 %v4127_v18 }
 0x662   : > { %3645 = vmatmul.mubr.msk.f32.vlgmr.msra.gmra.mrb[24].mxu0 %vm2491_vm13, %v2652_v38  ;;  %4129 = vmatprep.subr.bf16.mxu1 %v4314_v13  ;;  %v4139_v38 = vpack.c.bf16 %v3003_v37, %v3002_v36 }
 0x663   : > { %4086 = vmatpush3.bf16.msra.mxu0 %v4085_v35  ;;  %3667 = vmatprep.mubr.msk.f32.mxu0 %vm4316_vm8, %v4313_v7 }
 0x664   : > { %4087 = vmatprep.subr.bf16.mxu0 %v4314_v13 }
 0x665   : > { %4131 = vmatpush3.bf16.msra.mxu1 %v4130_v21 }
 0x666   : > { %4132 = vmatprep.subr.bf16.mxu1 %v4314_v13 }
 0x667   : > { %4089 = vmatpush3.bf16.msra.mxu0 %v4088_v39  ;;  %v3004_v39 = vld [vmem:[%s5727_s13 + $0x20] sm:$0xff] }
 0x668   : > { %4090 = vmatprep.subr.bf16.mxu0 %v4314_v13  ;;  %v4142_v41 = vpack.c.bf16 %v3005_v40, %v3004_v39 }
 0x669   : > { %4134 = vmatpush3.bf16.msra.mxu1 %v4133_v24 }
 0x66a   : > { %3721 = vmatprep.subr.mxu1 %v4313_v7 }
 0x66b   : > { %4092 = vmatpush3.bf16.msra.mxu0 %v4091_v42  ;;  %v3006_v42 = vld [vmem:[%s5727_s13 + $0x30] sm:$0xff] }
 0x66c   : > { %4093 = vmatprep.subr.bf16.mxu0 %v4314_v13  ;;  %v4145_v44 = vpack.c.bf16 %v3007_v43, %v3006_v42 }
 0x66d   : > { %3722 = vmatpush3.msra.mxu1 %v2924_v25 }
 0x66e   : > { %4135 = vmatprep.subr.bf16.mxu1 %v4314_v13 }
 0x66f   : > { %4095 = vmatpush3.bf16.msra.mxu0 %v4094_v45  ;;  %v3008_v45 = vld [vmem:[%s5727_s13 + $0x40] sm:$0xff] }
 0x670   : > { %4096 = vmatprep.subr.bf16.mxu0 %v4314_v13  ;;  %v4148_v47 = vpack.c.bf16 %v3009_v46, %v3008_v45 }
 0x673   : > { %4098 = vmatpush3.bf16.msra.mxu0 %v4097_v48  ;;  %v3010_v48 = vld [vmem:[%s5727_s13 + $0x50] sm:$0xf] }
 0x674   : > { %4099 = vmatprep.subr.bf16.mxu0 %v4314_v13 }
 0x676   : > { %3668 = vmatmul.mubr.msk.f32.vlgmr.msra.gmra.mrb[24].mxu0 %vm2491_vm13, %v2738_v57 }
 0x677   : > { %4101 = vmatpush3.bf16.msra.mxu0 %v4100_v51  ;;  %3690 = vmatprep.mubr.msk.f32.mxu0 %vm4316_vm8, %v4313_v7 }
 0x678   : > { %4102 = vmatprep.subr.bf16.mxu0 %v4314_v13 }
 0x67b   : > { %4104 = vmatpush3.bf16.msra.mxu0 %v4103_v58 }
 0x67c   : > { %4105 = vmatprep.subr.bf16.mxu0 %v4314_v13 }
 0x67f   : > { %4107 = vmatpush3.bf16.msra.mxu0 %v4106_v61 }
 0x680   : > { %4108 = vmatprep.subr.bf16.mxu0 %v4314_v13 }
 0x683   : > { %4110 = vmatpush3.bf16.msra.mxu0 %v4109_v55 }
 0x684   : > { %4111 = vmatprep.subr.bf16.mxu0 %v4314_v13 }
 0x687   : > { %4113 = vmatpush3.bf16.msra.mxu0 %v4112_v0 }
 0x68a   : > { %3691 = vmatmul.mubr.msk.f32.vlgmr.msra.gmra.mrb[24].mxu0 %vm2491_vm13, %v2824_v1 }
 0x721   : > { %v2561_v26 = vpop.f32.mrb[20].mxu1 }
 0x722   : > { %v3600_v27 = vpop.f32.mrb[21].mxu1  ;;  %v2565_v31 = vadd.f32 %v2561_v26, %v2479_v28 }
 0x75d   : > { %v2905_v32 = vpop.f32.mrb[24].mxu0 }
 0x75e   : > { %v4151_v34 = vadd.f32 %v2905_v32, %v2565_v31  ;;  %v3692_v35 = vpop.f32.mrb[25].mxu0 }
 0x760   : > { %3724 = vmatmul.mubr.msk.f32.vlgmr.msra.gmra.mrb[22].mxu1 %vm2926_vm14, %v4151_v34 }
 0x761   : > { %4137 = vmatpush3.bf16.msra.mxu1 %v4136_v33  ;;  %3748 = vmatprep.mubr.msk.f32.mxu1 %vm4316_vm8, %v4313_v7 }
 0x762   : > { %4138 = vmatprep.subr.bf16.mxu1 %v4314_v13 }
 0x765   : > { %4140 = vmatpush3.bf16.msra.mxu1 %v4139_v38 }
 0x766   : > { %4141 = vmatprep.subr.bf16.mxu1 %v4314_v13 }
 0x769   : > { %4143 = vmatpush3.bf16.msra.mxu1 %v4142_v41 }
 0x76a   : > { %4144 = vmatprep.subr.bf16.mxu1 %v4314_v13 }
 0x76d   : > { %4146 = vmatpush3.bf16.msra.mxu1 %v4145_v44 }
 0x76e   : > { %4147 = vmatprep.subr.bf16.mxu1 %v4314_v13 }
 0x771   : > { %4149 = vmatpush3.bf16.msra.mxu1 %v4148_v47 }
 0x772   : > { %3746 = vmatprep.subr.mxu1 %v4313_v7  ;;  %v3011_v7 = vld [vmem:[%s5728_s14] sm:$0x1] }
 0x775   : > { %3747 = vmatpush3.msk.msra.mxu1 %vm1353_vm3, %v3010_v48 }
 0x833   : > { %v2996_v50 = vpop.f32.mrb[22].mxu1 }
 0x834   : > { %v2997_v51 = vadd.f32 %v2996_v50, %v2925_v49  ;;  %v3725_v54 = vpop.f32.mrb[23].mxu1 }
 0x836   : > { %3749 = vmatmul.mubr.msk.f32.vlgmr.msra.gmra.mrb[24].mxu1 %vm1518_vm7, %v2997_v51 }
 0x909   : > { %v3084_v13 = vpop.f32.mrb[24].mxu1 }
 0x90a   : > { %v3085_v56 = vadd.f32 %v3084_v13, %v3011_v7  ;;  %v3750_v57 = vpop.f32.mrb[25].mxu1 }
 0x90c   : > { %3088 = vst [vmem:[%s486_s16] sm:$0x1] %v3085_v56 }
 0x90d   : > { %4262 = shalt.err (!%p4259_p3)
}
 0x90e   : > { %s4263_s29 = scalar_lea.hbm %s5672_s23, 16  ;;  %s4267_s27 = scalar_lea.hbm %s5729_s15, 32 }
 0x90f   : > { %p4264_p4 = scmp.ne.s32.totalorder %s5672_s23, %s4263_s29  ;;  %p4268_p9 = scmp.lt.u32.totalorder %s5672_s23, %s5729_s15 }
 0x910   : > { %p4269_p10 = scmp.lt.u32.totalorder %s4267_s27, %s4263_s29  ;;  %p4271_p12 = scmp.lt.u32.totalorder %s4263_s29, %s5672_s23 }
 0x911   : > { %p4265_p7 = pnand %p4264_p4, %p4436_p5 }
 0x912   : > { %p4270_p11 = por %p4269_p10, %p4268_p9 }
 0x913   : > { %p4266_p8 = pneg %p4265_p7 }
 0x914   : > { %p4272_p13 = por %p4271_p12, %p4270_p11 }
 0x916   : > { %p4273_p0 = pnand %p4272_p13, %p4266_p8 }
 0x918   : > { %4276 = shalt.err (!%p4273_p0)
}
 0x919   : > { %4206 = dma.vmem_to_hbm [thread:$0]  (%p4436_p5), %s5674_s17, 16, %s5672_s23, %s3090_s0  }
 0x91a PF: > { %s5746_s18 = sld [smem:[#allocation9_spill]]  ;;  %s5747_s20 = sld [smem:[#allocation7_spill]] }
 0x920   : > { %p4212_p1 = scmp.ge.s32.totalorder %s5746_s18, 2  ;;  %s3114_s24 = sand.u32 1, %s5747_s20  }
 0x921   : > { %s3115_s21 = scalar_lea.sflag [#allocation5], %s3114_s24 }
 0x922   : > { %p4209_p2 = pnand %p4212_p1, %p4440_p6 }
 0x924   : > { %4294 = dma.done.wait (!%p4209_p2), %s3115_s21, 16  }
 0x925   : > { %4296 = vsyncadd (!%p4209_p2), %s3115_s21, 4294967280  ;;  %s5749_s21 = sld [smem:[#allocation10_spill]]  ;;  %s5750_s29 = sld [smem:[#allocation8_spill]] }
 0x926   : > { %s5751_s20 = sld [smem:[#allocation11_spill]]  ;;  %s5752_s18 = smov %s4303_s19 }
 0x92b   : > { %p25_p3 = scmp.ge.s32.totalorder %s5749_s21, 4   ;;  %s5753_s19 = smov %s5750_s29 }
 0x92d   :  { %27 = sbr.rel (!%p25_p3) target bundleno = 5 (0x5), region = 131 }
 0x934   :  { %3119 = vsyncpa [#allocation5], 1 }
 0x935   :  { %3121 = vsyncpa [#allocation5 + $0x1], 1 }

</bundles_post_ra>
